<compile_context>
chip_gen: v6e
topology: v6e:2x2x1
jax: 0.10.0
libtpu: 0.0.40
codegen_flags: <defaults>
</compile_context>

<pallas_src>
import functools

import jax
import jax.numpy as jnp
from jax import lax
from jax.experimental import pallas as pl
from jax.experimental.pallas import tpu as pltpu

EPS = 1e-5  # PyTorch BatchNorm2d default


def _vmem_limit_bytes():
    """Scoped-VMEM limit derived from the chip (v5e/v6e: 128 MiB, v7x: 64 MiB)."""
    cap = 64 * 1024 * 1024
    try:
        cap = int(pltpu.get_tpu_info().vmem_capacity_bytes)
    except Exception:
        pass
    return max(32 * 1024 * 1024, min(3 * cap // 4, 100 * 1024 * 1024))


def _pick_row_tile(H, W, cap_rows):
    """Largest divisor TH of H with TH*W conv-output rows per tile <= cap_rows."""
    best = 1
    for th in range(1, H + 1):
        if H % th == 0 and th * W <= cap_rows:
            best = th
    return best


def _pick_out_tile(H, W, cap_rows):
    """Largest divisor TH of H with TH*W <= cap_rows and TH*W % 128 == 0
    (lane-dense final stores).  Falls back to the full image, which is legal
    because the block then spans the full last dimension."""
    best = None
    for th in range(1, H + 1):
        if H % th == 0 and th * W <= cap_rows and (th * W) % 128 == 0:
            best = th
    return best if best is not None else H


# --------------------------------------------------------------------------- #
# Pass 1: 3x3 conv as one im2col MXU matmul + per-channel sum / sumsq          #
# --------------------------------------------------------------------------- #
def _conv_stats_kernel(x_ref, w_ref, conv_ref, stats_ref, *, TH, W, Cin):
    # x_ref     : (Hp, Wp, Cin)   padded NHWC image, VMEM-resident across h
    # w_ref     : (9*Cin, Cout)   im2col weights, resident for the whole grid
    # conv_ref  : (TH*W, Cout)    conv intermediate tile (row = y_local*W + x)
    # stats_ref : (8, Cout)       row 0: sum, row 1: sumsq (per-image partials)
    h = pl.program_id(1)
    TM = TH * W

    @pl.when(h == 0)
    def _init():
        stats_ref[...] = jnp.zeros_like(stats_ref)

    row0 = pl.multiple_of(h * TH, TH)    # first padded input row of this tile

    # im2col in VMEM: 9 shifted windows concatenated along the channel axis,
    # then a single K = 9*Cin MXU contraction.
    cols = []
    for ky in range(3):
        for kx in range(3):
            xs = x_ref[pl.ds(row0 + ky, TH), pl.ds(kx, W), :]
            cols.append(xs.reshape(TM, Cin))
    patch = jnp.concatenate(cols, axis=-1)                        # (TM, 9*Cin)
    acc = jnp.dot(patch, w_ref[...], preferred_element_type=jnp.float32)

    conv = acc.astype(conv_ref.dtype)
    conv_ref[...] = conv

    # Partial BN statistics, computed on the values pass 2 will actually read
    # and reduced on the MXU (which has slack for small Cin/Cout): selector
    # matmuls put the channel sum in row 0 and the sum of squares in row 1,
    # finished with a single unmasked (8, Cout) accumulate.
    v = conv.astype(jnp.float32)
    ridx = lax.broadcasted_iota(jnp.int32, (8, TM), 0)
    sel0 = (ridx == 0).astype(jnp.float32)
    sel1 = (ridx == 1).astype(jnp.float32)
    stats_ref[...] += (
        jnp.dot(sel0, v, preferred_element_type=jnp.float32)
        + jnp.dot(sel1, v * v, preferred_element_type=jnp.float32))


# --------------------------------------------------------------------------- #
# Pass 2: folded BN affine + ReLU, written directly in the final NCHW layout   #
# --------------------------------------------------------------------------- #
def _bn_relu_nchw_kernel(y_ref, scale_ref, shift_ref, o_ref):
    # y_ref  : (TM2, Cout) conv intermediate tile
    # scale/shift : (1, Cout) folded BN affine
    # o_ref  : (Cout, TM2) final channel-major tile in the caller's dtype
    y = y_ref[...].astype(jnp.float32)
    z = jnp.maximum(y * scale_ref[...] + shift_ref[...], 0.0)
    o_ref[...] = jnp.transpose(z, (1, 0)).astype(o_ref.dtype)


@functools.partial(jax.jit,
                   static_argnames=("use_bf16", "row_tile_cap", "out_tile_cap"))
def conv_bn_module_forward(x_nchw, conv_w, bn_gamma, bn_beta, *,
                           use_bf16=True, row_tile_cap=1024, out_tile_cap=4096):
    """ConvBNModule.forward.  x_nchw: (N, Cin, H, W); conv_w: (Cout, Cin, 3, 3)."""
    N, Cin, H, W = x_nchw.shape
    Cout = conv_w.shape[0]
    assert W % 8 == 0, "W must be a multiple of 8 (sublane-aligned row tiles)"
    op_dtype = jnp.bfloat16 if use_bf16 else jnp.float32    # MXU operand dtype
    mid_dtype = jnp.bfloat16 if use_bf16 else jnp.float32   # conv intermediate
    out_dtype = x_nchw.dtype
    vmem_limit = _vmem_limit_bytes()

    # ---- glue: NCHW -> padded NHWC (one wrapper pass over the small input) ----
    # TODO(synk): fold the pad/transpose into pass 1 (halo row-tiles with
    # in-kernel edge masking + transpose) to drop this extra HBM pass; also use
    # (TH+2)-row halo tiles instead of whole-image residency for very large
    # images on v7x (64 MiB VMEM).
    x = jnp.transpose(x_nchw, (0, 2, 3, 1))
    xpad = jnp.pad(x.astype(op_dtype), ((0, 0), (1, 1), (1, 1), (0, 0)))
    Hp, Wp = H + 2, W + 2

    # PyTorch weight (Cout, Cin, ky, kx) -> im2col layout (9*Cin, Cout)
    w = jnp.transpose(conv_w.astype(jnp.float32), (2, 3, 1, 0))
    w = w.reshape(9 * Cin, Cout).astype(op_dtype)

    TH = _pick_row_tile(H, W, row_tile_cap)   # output image-rows per grid step
    n_h = H // TH
    TM = TH * W
    R = N * H * W

    kernel = functools.partial(_conv_stats_kernel, TH=TH, W=W, Cin=Cin)
    bytes_p1 = (xpad.size * xpad.dtype.itemsize + w.size * w.dtype.itemsize
                + R * Cout * jnp.dtype(mid_dtype).itemsize + N * 8 * Cout * 4)
    conv_out, stats = pl.pallas_call(
        kernel,
        out_shape=(jax.ShapeDtypeStruct((R, Cout), mid_dtype),
                   jax.ShapeDtypeStruct((N * 8, Cout), jnp.float32)),
        grid=(N, n_h),
        in_specs=[
            # Full padded image per n; block index constant along h -> one DMA
            # per image.
            pl.BlockSpec((None, Hp, Wp, Cin), lambda n, h: (n, 0, 0, 0)),
            # Weights resident for the whole grid.
            pl.BlockSpec((9 * Cin, Cout), lambda n, h: (0, 0)),
        ],
        out_specs=(
            pl.BlockSpec((TM, Cout), lambda n, h: (n * n_h + h, 0)),
            # Per-image stats accumulator, revisited across the (arbitrary) h axis.
            pl.BlockSpec((8, Cout), lambda n, h: (n, 0)),
        ),
        compiler_params=pltpu.CompilerParams(
            dimension_semantics=("parallel", "arbitrary"),
            vmem_limit_bytes=vmem_limit),
        cost_estimate=pl.CostEstimate(flops=2 * R * 9 * Cin * Cout,
                                      transcendentals=0,
                                      bytes_accessed=bytes_p1),
    )(xpad, w)

    # ---- fold batch stats + affine into one scale/shift (tiny, runs once) ----
    stats = stats.reshape(N, 8, Cout)
    ch_sum = jnp.sum(stats[:, 0, :], axis=0)       # combine per-image /
    ch_sumsq = jnp.sum(stats[:, 1, :], axis=0)     #   per-core partials
    r = jnp.float32(R)
    mean = ch_sum / r
    var = jnp.maximum(ch_sumsq / r - mean * mean, 0.0)  # biased (training) var
    inv_std = lax.rsqrt(var + EPS)
    gamma = bn_gamma.astype(jnp.float32)
    beta = bn_beta.astype(jnp.float32)
    scale = (gamma * inv_std).reshape(1, Cout)
    shift = (beta - mean * gamma * inv_std).reshape(1, Cout)

    # ---- pass 2: relu(conv*scale + shift) written straight in NCHW layout ----
    TH2 = _pick_out_tile(H, W, out_tile_cap)
    n_h2 = H // TH2
    TM2 = TH2 * W
    out3 = pl.pallas_call(
        _bn_relu_nchw_kernel,
        out_shape=jax.ShapeDtypeStruct((N, Cout, H * W), out_dtype),
        grid=(N, n_h2),
        in_specs=[
            pl.BlockSpec((TM2, Cout), lambda n, h: (n * n_h2 + h, 0)),
            pl.BlockSpec((1, Cout), lambda n, h: (0, 0)),
            pl.BlockSpec((1, Cout), lambda n, h: (0, 0)),
        ],
        out_specs=pl.BlockSpec((None, Cout, TM2), lambda n, h: (n, 0, h)),
        compiler_params=pltpu.CompilerParams(
            dimension_semantics=("parallel", "parallel"),
            vmem_limit_bytes=vmem_limit),
        cost_estimate=pl.CostEstimate(
            flops=3 * R * Cout, transcendentals=0,
            bytes_accessed=R * Cout * (jnp.dtype(mid_dtype).itemsize
                                       + jnp.dtype(out_dtype).itemsize)
                           + 2 * Cout * 4),
    )(conv_out, scale, shift)

    # Metadata-only reshape (no HBM traffic): (N, Cout, H*W) -> (N, Cout, H, W)
    return out3.reshape(N, Cout, H, W)


def _reference_forward(x_nchw, conv_w, bn_gamma, bn_beta):
    """Pure-JAX reference (f32 conv + training-mode BN + ReLU) for validation."""
    y = lax.conv_general_dilated(
        x_nchw.astype(jnp.float32), conv_w.astype(jnp.float32),
        window_strides=(1, 1), padding=((1, 1), (1, 1)),
        dimension_numbers=("NCHW", "OIHW", "NCHW"))
    mean = jnp.mean(y, axis=(0, 2, 3), keepdims=True)
    var = jnp.mean((y - mean) ** 2, axis=(0, 2, 3), keepdims=True)
    yhat = (y - mean) * lax.rsqrt(var + EPS)
    yhat = yhat * bn_gamma.reshape(1, -1, 1, 1) + bn_beta.reshape(1, -1, 1, 1)
    return jnp.maximum(yhat, 0.0)


if __name__ == "__main__":
    key = jax.random.PRNGKey(0)
    k_x, k_w, k_g, k_b = jax.random.split(key, 4)

    N, Cin, Cout, H, W = 2, 4, 8, 16, 16
    x = jax.random.normal(k_x, (N, Cin, H, W), dtype=jnp.float32)
    # Conv2d(4 -> 8, k=3, padding=1, bias=False) weight: (Cout, Cin, 3, 3)
    conv_w = jax.random.normal(k_w, (Cout, Cin, 3, 3), dtype=jnp.float32) * 0.1
    # BatchNorm2d(8) affine parameters (perturbed so the affine path is exercised).
    bn_gamma = 1.0 + 0.1 * jax.random.normal(k_g, (Cout,), dtype=jnp.float32)
    bn_beta = 0.1 * jax.random.normal(k_b, (Cout,), dtype=jnp.float32)

    ref = _reference_forward(x, conv_w, bn_gamma, bn_beta)

    # f32 path.  Small tile caps force multiple row-tiles per image so the
    # resident per-image stats accumulator and the pass-2 tiling are exercised.
    # Tolerance is set conservatively to stay robust to MXU f32-pass rounding.
    out_f32 = jax.block_until_ready(
        conv_bn_module_forward(x, conv_w, bn_gamma, bn_beta,
                               use_bf16=False, row_tile_cap=128, out_tile_cap=128))
    assert out_f32.shape == (N, Cout, H, W)
    assert jnp.allclose(out_f32, ref, atol=2e-2, rtol=2e-2), "f32 mismatch vs reference"

    # bf16 MXU-operand / bf16-intermediate path (default fast path): tolerance
    # loosened for bf16 operand and intermediate rounding.
    out_bf16 = jax.block_until_ready(
        conv_bn_module_forward(x, conv_w, bn_gamma, bn_beta,
                               use_bf16=True, row_tile_cap=128, out_tile_cap=128))
    assert out_bf16.shape == (N, Cout, H, W)
    assert jnp.allclose(out_bf16, ref, atol=6e-2, rtol=6e-2), "bf16 mismatch vs reference"

    print("KERNEL_OK")
</pallas_src>

<mosaic_0001>
module attributes {stable_mosaic.version = 11 : i64} {
  func.func @_conv_stats_kernel(%arg0: i32, %arg1: i32, %arg2: memref<1x18x18x4xf32, #tpu.memory_space<vmem>>, %arg3: memref<36x8xf32, #tpu.memory_space<vmem>>, %arg4: memref<128x8xf32, #tpu.memory_space<vmem>>, %arg5: memref<8x8xf32, #tpu.memory_space<vmem>>) attributes {dimension_semantics = [#tpu.dimension_semantics<parallel>, #tpu.dimension_semantics<arbitrary>], iteration_bounds = array<i64: 2, 2>, scalar_prefetch = 0 : i64, scratch_operands = 0 : i64, tpu.core_type = #tpu.core_type<tc>, window_params = [{transform_indices = @transform_0, window_bounds = array<i64: 1, 18, 18, 4>}, {pipeline_mode = #tpu.pipeline_mode<synchronous>, transform_indices = @transform_1, window_bounds = array<i64: 36, 8>}, {transform_indices = @transform_2, window_bounds = array<i64: 128, 8>}, {transform_indices = @transform_3, window_bounds = array<i64: 8, 8>}]} {
    %c0_i32 = arith.constant 0 : i32
    %0 = arith.cmpi eq, %arg1, %c0_i32 : i32
    %1 = arith.extui %0 : i1 to i32
    %c0_i32_0 = arith.constant 0 : i32
    %2 = arith.cmpi ne, %1, %c0_i32_0 : i32
    scf.if %2 {
      %cst_44 = arith.constant 0.000000e+00 : f32
      %70 = vector.broadcast %cst_44 : f32 to vector<8x8xf32>
      %c0_45 = arith.constant 0 : index
      %c0_46 = arith.constant 0 : index
      %71 = vector.load %arg5[%c0_45, %c0_46] : memref<8x8xf32, #tpu.memory_space<vmem>>, vector<8x8xf32>
      tpu.vector_store %arg5[%c0_45, %c0_46], %70 {strides = array<i32>} : memref<8x8xf32, #tpu.memory_space<vmem>>, vector<8x8xf32>,
    } else {
    }
    %c8_i32 = arith.constant 8 : i32
    %3 = arith.muli %arg1, %c8_i32 : i32
    %4 = tpu.assume_multiple %3, 8 : i32
    %c0_i32_1 = arith.constant 0 : i32
    %5 = arith.addi %4, %c0_i32_1 : i32
    %c0 = arith.constant 0 : index
    %6 = arith.index_cast %5 : i32 to index
    %c0_2 = arith.constant 0 : index
    %c0_3 = arith.constant 0 : index
    %7 = vector.load %arg2[%c0, %6, %c0_2, %c0_3] : memref<1x18x18x4xf32, #tpu.memory_space<vmem>>, vector<1x8x16x4xf32>
    %8 = vector.shape_cast %7 : vector<1x8x16x4xf32> to vector<8x16x4xf32>
    %9 = vector.shape_cast %8 : vector<8x16x4xf32> to vector<128x4xf32>
    %c0_i32_4 = arith.constant 0 : i32
    %10 = arith.addi %4, %c0_i32_4 : i32
    %c0_5 = arith.constant 0 : index
    %11 = arith.index_cast %10 : i32 to index
    %c1 = arith.constant 1 : index
    %c0_6 = arith.constant 0 : index
    %12 = vector.load %arg2[%c0_5, %11, %c1, %c0_6] : memref<1x18x18x4xf32, #tpu.memory_space<vmem>>, vector<1x8x16x4xf32>
    %13 = vector.shape_cast %12 : vector<1x8x16x4xf32> to vector<8x16x4xf32>
    %14 = vector.shape_cast %13 : vector<8x16x4xf32> to vector<128x4xf32>
    %c0_i32_7 = arith.constant 0 : i32
    %15 = arith.addi %4, %c0_i32_7 : i32
    %c0_8 = arith.constant 0 : index
    %16 = arith.index_cast %15 : i32 to index
    %c2 = arith.constant 2 : index
    %c0_9 = arith.constant 0 : index
    %17 = vector.load %arg2[%c0_8, %16, %c2, %c0_9] : memref<1x18x18x4xf32, #tpu.memory_space<vmem>>, vector<1x8x16x4xf32>
    %18 = vector.shape_cast %17 : vector<1x8x16x4xf32> to vector<8x16x4xf32>
    %19 = vector.shape_cast %18 : vector<8x16x4xf32> to vector<128x4xf32>
    %c1_i32 = arith.constant 1 : i32
    %20 = arith.addi %4, %c1_i32 : i32
    %c0_10 = arith.constant 0 : index
    %21 = arith.index_cast %20 : i32 to index
    %c0_11 = arith.constant 0 : index
    %c0_12 = arith.constant 0 : index
    %22 = vector.load %arg2[%c0_10, %21, %c0_11, %c0_12] : memref<1x18x18x4xf32, #tpu.memory_space<vmem>>, vector<1x8x16x4xf32>
    %23 = vector.shape_cast %22 : vector<1x8x16x4xf32> to vector<8x16x4xf32>
    %24 = vector.shape_cast %23 : vector<8x16x4xf32> to vector<128x4xf32>
    %c1_i32_13 = arith.constant 1 : i32
    %25 = arith.addi %4, %c1_i32_13 : i32
    %c0_14 = arith.constant 0 : index
    %26 = arith.index_cast %25 : i32 to index
    %c1_15 = arith.constant 1 : index
    %c0_16 = arith.constant 0 : index
    %27 = vector.load %arg2[%c0_14, %26, %c1_15, %c0_16] : memref<1x18x18x4xf32, #tpu.memory_space<vmem>>, vector<1x8x16x4xf32>
    %28 = vector.shape_cast %27 : vector<1x8x16x4xf32> to vector<8x16x4xf32>
    %29 = vector.shape_cast %28 : vector<8x16x4xf32> to vector<128x4xf32>
    %c1_i32_17 = arith.constant 1 : i32
    %30 = arith.addi %4, %c1_i32_17 : i32
    %c0_18 = arith.constant 0 : index
    %31 = arith.index_cast %30 : i32 to index
    %c2_19 = arith.constant 2 : index
    %c0_20 = arith.constant 0 : index
    %32 = vector.load %arg2[%c0_18, %31, %c2_19, %c0_20] : memref<1x18x18x4xf32, #tpu.memory_space<vmem>>, vector<1x8x16x4xf32>
    %33 = vector.shape_cast %32 : vector<1x8x16x4xf32> to vector<8x16x4xf32>
    %34 = vector.shape_cast %33 : vector<8x16x4xf32> to vector<128x4xf32>
    %c2_i32 = arith.constant 2 : i32
    %35 = arith.addi %4, %c2_i32 : i32
    %c0_21 = arith.constant 0 : index
    %36 = arith.index_cast %35 : i32 to index
    %c0_22 = arith.constant 0 : index
    %c0_23 = arith.constant 0 : index
    %37 = vector.load %arg2[%c0_21, %36, %c0_22, %c0_23] : memref<1x18x18x4xf32, #tpu.memory_space<vmem>>, vector<1x8x16x4xf32>
    %38 = vector.shape_cast %37 : vector<1x8x16x4xf32> to vector<8x16x4xf32>
    %39 = vector.shape_cast %38 : vector<8x16x4xf32> to vector<128x4xf32>
    %c2_i32_24 = arith.constant 2 : i32
    %40 = arith.addi %4, %c2_i32_24 : i32
    %c0_25 = arith.constant 0 : index
    %41 = arith.index_cast %40 : i32 to index
    %c1_26 = arith.constant 1 : index
    %c0_27 = arith.constant 0 : index
    %42 = vector.load %arg2[%c0_25, %41, %c1_26, %c0_27] : memref<1x18x18x4xf32, #tpu.memory_space<vmem>>, vector<1x8x16x4xf32>
    %43 = vector.shape_cast %42 : vector<1x8x16x4xf32> to vector<8x16x4xf32>
    %44 = vector.shape_cast %43 : vector<8x16x4xf32> to vector<128x4xf32>
    %c2_i32_28 = arith.constant 2 : i32
    %45 = arith.addi %4, %c2_i32_28 : i32
    %c0_29 = arith.constant 0 : index
    %46 = arith.index_cast %45 : i32 to index
    %c2_30 = arith.constant 2 : index
    %c0_31 = arith.constant 0 : index
    %47 = vector.load %arg2[%c0_29, %46, %c2_30, %c0_31] : memref<1x18x18x4xf32, #tpu.memory_space<vmem>>, vector<1x8x16x4xf32>
    %48 = vector.shape_cast %47 : vector<1x8x16x4xf32> to vector<8x16x4xf32>
    %49 = vector.shape_cast %48 : vector<8x16x4xf32> to vector<128x4xf32>
    %50 = tpu.concatenate %9, %14, %19, %24, %29, %34, %39, %44, %49 in 1 : vector<128x4xf32>, vector<128x4xf32>, vector<128x4xf32>, vector<128x4xf32>, vector<128x4xf32>, vector<128x4xf32>, vector<128x4xf32>, vector<128x4xf32>, vector<128x4xf32> -> vector<128x36xf32>
    %c0_32 = arith.constant 0 : index
    %c0_33 = arith.constant 0 : index
    %51 = vector.load %arg3[%c0_32, %c0_33] : memref<36x8xf32, #tpu.memory_space<vmem>>, vector<36x8xf32>
    %cst = arith.constant dense<0.000000e+00> : vector<128x8xf32>
    %52 = tpu.matmul %50, %51, %cst {dimension_numbers = #tpu.dot_dimension_numbers<[1], [0], [0], [1], [0, 0, 1, 1], [], []>} : vector<128x36xf32>, vector<36x8xf32>, vector<128x8xf32> -> vector<128x8xf32>
    %c0_34 = arith.constant 0 : index
    %c0_35 = arith.constant 0 : index
    %53 = vector.load %arg4[%c0_34, %c0_35] : memref<128x8xf32, #tpu.memory_space<vmem>>, vector<128x8xf32>
    tpu.vector_store %arg4[%c0_34, %c0_35], %52 {strides = array<i32>} : memref<128x8xf32, #tpu.memory_space<vmem>>, vector<128x8xf32>,
    %54 = tpu.iota {dimensions = array<i32: 0>} : vector<8x128xi32>
    %c0_i32_36 = arith.constant 0 : i32
    %55 = vector.broadcast %c0_i32_36 : i32 to vector<8x128xi32>
    %56 = arith.cmpi eq, %54, %55 : vector<8x128xi32>
    %57 = arith.extui %56 : vector<8x128xi1> to vector<8x128xi32>
    %58 = arith.sitofp %57 : vector<8x128xi32> to vector<8x128xf32>
    %c1_i32_37 = arith.constant 1 : i32
    %59 = vector.broadcast %c1_i32_37 : i32 to vector<8x128xi32>
    %60 = arith.cmpi eq, %54, %59 : vector<8x128xi32>
    %61 = arith.extui %60 : vector<8x128xi1> to vector<8x128xi32>
    %62 = arith.sitofp %61 : vector<8x128xi32> to vector<8x128xf32>
    %c0_38 = arith.constant 0 : index
    %c0_39 = arith.constant 0 : index
    %63 = vector.load %arg5[%c0_38, %c0_39] : memref<8x8xf32, #tpu.memory_space<vmem>>, vector<8x8xf32>
    %cst_40 = arith.constant dense<0.000000e+00> : vector<8x8xf32>
    %64 = tpu.matmul %58, %52, %cst_40 {dimension_numbers = #tpu.dot_dimension_numbers<[1], [0], [0], [1], [0, 0, 1, 1], [], []>} : vector<8x128xf32>, vector<128x8xf32>, vector<8x8xf32> -> vector<8x8xf32>
    %65 = arith.mulf %52, %52 : vector<128x8xf32>
    %cst_41 = arith.constant dense<0.000000e+00> : vector<8x8xf32>
    %66 = tpu.matmul %62, %65, %cst_41 {dimension_numbers = #tpu.dot_dimension_numbers<[1], [0], [0], [1], [0, 0, 1, 1], [], []>} : vector<8x128xf32>, vector<128x8xf32>, vector<8x8xf32> -> vector<8x8xf32>
    %67 = arith.addf %64, %66 : vector<8x8xf32>
    %68 = arith.addf %63, %67 : vector<8x8xf32>
    %c0_42 = arith.constant 0 : index
    %c0_43 = arith.constant 0 : index
    %69 = vector.load %arg5[%c0_42, %c0_43] : memref<8x8xf32, #tpu.memory_space<vmem>>, vector<8x8xf32>
    tpu.vector_store %arg5[%c0_42, %c0_43], %68 {strides = array<i32>} : memref<8x8xf32, #tpu.memory_space<vmem>>, vector<8x8xf32>,
    return
  }
  func.func @transform_0(%arg0: i32, %arg1: i32) -> (i32, i32, i32, i32) {
    %c0_i32 = arith.constant 0 : i32
    %c0_i32_0 = arith.constant 0 : i32
    %c0_i32_1 = arith.constant 0 : i32
    %c0_i32_2 = arith.constant 0 : i32
    return %arg0, %c0_i32, %c0_i32_0, %c0_i32_1 : i32, i32, i32, i32
  }
  func.func @transform_1(%arg0: i32, %arg1: i32) -> (i32, i32) {
    %c0_i32 = arith.constant 0 : i32
    %c0_i32_0 = arith.constant 0 : i32
    %c0_i32_1 = arith.constant 0 : i32
    return %c0_i32, %c0_i32_0 : i32, i32
  }
  func.func @transform_2(%arg0: i32, %arg1: i32) -> (i32, i32) {
    %c2_i32 = arith.constant 2 : i32
    %0 = arith.muli %arg0, %c2_i32 : i32
    %1 = arith.addi %0, %arg1 : i32
    %c0_i32 = arith.constant 0 : i32
    %c0_i32_0 = arith.constant 0 : i32
    return %1, %c0_i32 : i32, i32
  }
  func.func @transform_3(%arg0: i32, %arg1: i32) -> (i32, i32) {
    %c0_i32 = arith.constant 0 : i32
    %c0_i32_0 = arith.constant 0 : i32
    return %arg0, %c0_i32 : i32, i32
  }
}

module attributes {stable_mosaic.version = 11 : i64} {
  func.func @_bn_relu_nchw_kernel(%arg0: i32, %arg1: i32, %arg2: memref<128x8xf32, #tpu.memory_space<vmem>>, %arg3: memref<1x8xf32, #tpu.memory_space<vmem>>, %arg4: memref<1x8xf32, #tpu.memory_space<vmem>>, %arg5: memref<1x8x128xf32, #tpu.memory_space<vmem>>) attributes {dimension_semantics = [#tpu.dimension_semantics<parallel>, #tpu.dimension_semantics<parallel>], iteration_bounds = array<i64: 2, 2>, scalar_prefetch = 0 : i64, scratch_operands = 0 : i64, tpu.core_type = #tpu.core_type<tc>, window_params = [{transform_indices = @transform_0, window_bounds = array<i64: 128, 8>}, {pipeline_mode = #tpu.pipeline_mode<synchronous>, transform_indices = @transform_1, window_bounds = array<i64: 1, 8>}, {pipeline_mode = #tpu.pipeline_mode<synchronous>, transform_indices = @transform_2, window_bounds = array<i64: 1, 8>}, {transform_indices = @transform_3, window_bounds = array<i64: 1, 8, 128>}]} {
    %c0 = arith.constant 0 : index
    %c0_0 = arith.constant 0 : index
    %0 = vector.load %arg2[%c0, %c0_0] : memref<128x8xf32, #tpu.memory_space<vmem>>, vector<128x8xf32>
    %c0_1 = arith.constant 0 : index
    %c0_2 = arith.constant 0 : index
    %1 = vector.load %arg3[%c0_1, %c0_2] : memref<1x8xf32, #tpu.memory_space<vmem>>, vector<1x8xf32>
    %2 = vector.broadcast %1 : vector<1x8xf32> to vector<128x8xf32>
    %3 = arith.mulf %0, %2 : vector<128x8xf32>
    %c0_3 = arith.constant 0 : index
    %c0_4 = arith.constant 0 : index
    %4 = vector.load %arg4[%c0_3, %c0_4] : memref<1x8xf32, #tpu.memory_space<vmem>>, vector<1x8xf32>
    %5 = vector.broadcast %4 : vector<1x8xf32> to vector<128x8xf32>
    %6 = arith.addf %3, %5 : vector<128x8xf32>
    %cst = arith.constant 0.000000e+00 : f32
    %7 = vector.broadcast %cst : f32 to vector<128x8xf32>
    %8 = arith.maximumf %6, %7 : vector<128x8xf32>
    %9 = tpu.transpose %8, [1, 0] : vector<128x8xf32> -> vector<8x128xf32>
    %c0_5 = arith.constant 0 : index
    %c0_6 = arith.constant 0 : index
    %c0_7 = arith.constant 0 : index
    %10 = vector.load %arg5[%c0_5, %c0_6, %c0_7] : memref<1x8x128xf32, #tpu.memory_space<vmem>>, vector<1x8x128xf32>
    %11 = vector.shape_cast %10 : vector<1x8x128xf32> to vector<8x128xf32>
    %12 = vector.shape_cast %9 : vector<8x128xf32> to vector<1x8x128xf32>
    tpu.vector_store %arg5[%c0_5, %c0_6, %c0_7], %12 {strides = array<i32>} : memref<1x8x128xf32, #tpu.memory_space<vmem>>, vector<1x8x128xf32>,
    return
  }
  func.func @transform_0(%arg0: i32, %arg1: i32) -> (i32, i32) {
    %c2_i32 = arith.constant 2 : i32
    %0 = arith.muli %arg0, %c2_i32 : i32
    %1 = arith.addi %0, %arg1 : i32
    %c0_i32 = arith.constant 0 : i32
    %c0_i32_0 = arith.constant 0 : i32
    return %1, %c0_i32 : i32, i32
  }
  func.func @transform_1(%arg0: i32, %arg1: i32) -> (i32, i32) {
    %c0_i32 = arith.constant 0 : i32
    %c0_i32_0 = arith.constant 0 : i32
    %c0_i32_1 = arith.constant 0 : i32
    return %c0_i32, %c0_i32_0 : i32, i32
  }
  func.func @transform_2(%arg0: i32, %arg1: i32) -> (i32, i32) {
    %c0_i32 = arith.constant 0 : i32
    %c0_i32_0 = arith.constant 0 : i32
    %c0_i32_1 = arith.constant 0 : i32
    return %c0_i32, %c0_i32_0 : i32, i32
  }
  func.func @transform_3(%arg0: i32, %arg1: i32) -> (i32, i32, i32) {
    %c0_i32 = arith.constant 0 : i32
    %c0_i32_0 = arith.constant 0 : i32
    return %arg0, %c0_i32, %arg1 : i32, i32, i32
  }
}

</mosaic_0001>

<bundles_post_ra>
// kernel: conv_bn_module_forward.3
= control target key start
LH: loop header
LB: loop body
LE: loop exit
PB: predicated region body
PF: predicated region fallthrough
CT: control target
= control target key end

     0   :  { %s514_s12 = smov 0   ;;  %s516_s13 = smov 0   ;;  %s635_s0 = inlined_call_operand.vmem [shape: f32[512,8], index: 0, kind: input, shape index: {}]   ;;  %s636_s1 = inlined_call_operand.vmem [shape: f32[1,8], index: 1, kind: input, shape index: {}]   ;;  %s637_s2 = inlined_call_operand.vmem [shape: f32[1,8], index: 2, kind: input, shape index: {}]   ;;  %s638_s3 = inlined_call_operand.vmem [shape: f32[2,8,256], index: 3, kind: output, shape index: {}]  }
   0x1   :  { %s518_s14 = smov 0   ;;  %s520_s15 = smov 0  }
   0x2   :  { %s522_s16 = smov 0  }
   0x3 LB: > { %s22_s17 = sadd.s32 1, %s484_s14  ;;  %s25_s18 = sadd.s32 1, %s488_s15  ;;  %s492_s16 = sphi %s522_s16, %s13_s16   ;;  %s488_s15 = sphi %s520_s15, %s642_s15   ;;  %s484_s14 = sphi %s518_s14, %s641_s14   ;;  %s480_s13 = sphi %s516_s13, %s640_s13   ;;  %s476_s12 = sphi %s514_s12, %s639_s12  }
   0x4   : > { %p23_p0 = scmp.ge.s32.totalorder %s22_s17, 2  ;;  %p404_p1 = scmp.ge.s32.totalorder %s492_s16, 1 }
   0x5   : > { %p160_p2 = scmp.lt.s32.totalorder %s492_s16, 5 }
   0x6   : > { %s644_s17 = smov (%p23_p0, %s22_s17), 0  ;;  %s646_s18 = smov (!%p23_p0, %s25_s18), %s488_s15 }
   0x7   : > { %p161_p3 = pnand %p404_p1, %p160_p2  ;;  %p27_p4 = scmp.ge.s32.totalorder %s646_s18, 2 }
   0x8   : > { %s405_s19 = sshll.u32 (!%p161_p3), %s480_s13, 1  ;;  %p199_p6 = scmp.lt.s32.totalorder (!%p161_p3), %s480_s13, 1 }
   0x9   : > { %s648_s18 = smov (%p27_p4, %s646_s18), 0  ;;  %164 = sbr.rel (%p161_p3) target bundleno = 150 (0x96), region = 32 }
   0xa   : > { %s190_s20 = sadd.s32 (!%p161_p3), %s476_s12, %s405_s19  ;;  %p201_p7 = scmp.lt.s32.totalorder (!%p161_p3), %s476_s12, 1 }
   0xb   : > { %s406_s21 = sshll.u32 (!%p161_p3), %s190_s20, 4 }
   0xc   : > { %p192_p5 = scmp.lt.s32.totalorder (!%p161_p3), %s406_s21, 63 }
   0xe   : > { %s650_s21 = smov (!%p192_p5, %s406_s21), 63  ;;  %v553_v0 = vld [vmem:[%s636_s1] ss:$0 sm:$0xff]  ;;  %s652_s13 = smov (!%p199_p6, %s480_s13), 1 }
   0xf   : > { %s407_s22 = sshll.u32 %s650_s21, 3  ;;  %v563_v1 = vld [vmem:[%s637_s2] ss:$0 sm:$0xff]  ;;  %s654_s12 = smov (!%p201_p7, %s476_s12), 1 }
  0x10   : > { %s558_s27 = scalar_lea.vmem %s635_s0, %s407_s22  ;;  %s408_s30 = sshll.u32 %s652_s13, 1 }
  0x11   : > { %v207_v2 = vld [vmem:[%s558_s27] sm:$0xff]  ;;  %v208_v3 = vld [vmem:[%s558_s27 + $0x8] sm:$0xff]  ;;  %v209_v4 = vld [vmem:[%s558_s27 + $0x10] sm:$0xff]  ;;  %s204_s4 = sadd.s32 %s408_s30, %s654_s12 }
  0x12   : > { %v230_v5 = vmul.f32 %v553_v0, %v207_v2  ;;  %v231_v6 = vmul.f32 %v553_v0, %v208_v3  ;;  %v232_v9 = vmul.f32 %v553_v0, %v209_v4  ;;  %v210_v10 = vld [vmem:[%s558_s27 + $0x18] sm:$0xff]  ;;  %v211_v15 = vld [vmem:[%s558_s27 + $0x20] sm:$0xff]  ;;  %v212_v19 = vld [vmem:[%s558_s27 + $0x28] sm:$0xff]  ;;  %s409_s5 = sshll.u32 %s204_s4, 3 }
  0x13   : > { %v233_v14 = vmul.f32 %v553_v0, %v210_v10  ;;  %v234_v18 = vmul.f32 %v553_v0, %v211_v15  ;;  %v235_v22 = vmul.f32 %v553_v0, %v212_v19  ;;  %v213_v23 = vld [vmem:[%s558_s27 + $0x30] sm:$0xff]  ;;  %v214_v27 = vld [vmem:[%s558_s27 + $0x38] sm:$0xff]  ;;  %v215_v31 = vld [vmem:[%s558_s27 + $0x40] sm:$0xff]  ;;  %s206_s8 = scalar_lea.vmem %s638_s3, %s409_s5 }
  0x14   : > { %v253_v7 = vadd.f32 %v563_v1, %v230_v5  ;;  %v254_v8 = vadd.f32 %v563_v1, %v231_v6  ;;  %v255_v13 = vadd.f32 %v563_v1, %v232_v9  ;;  %v236_v26 = vmul.f32 %v553_v0, %v213_v23  ;;  %v216_v35 = vld [vmem:[%s558_s27 + $0x48] sm:$0xff]  ;;  %v217_v39 = vld [vmem:[%s558_s27 + $0x50] sm:$0xff]  ;;  %v218_v43 = vld [vmem:[%s558_s27 + $0x58] sm:$0xff] }
  0x15   : > { %v256_v17 = vadd.f32 %v563_v1, %v233_v14  ;;  %v257_v21 = vadd.f32 %v563_v1, %v234_v18  ;;  %v258_v25 = vadd.f32 %v563_v1, %v235_v22  ;;  %v237_v30 = vmul.f32 %v553_v0, %v214_v27  ;;  %v219_v47 = vld [vmem:[%s558_s27 + $0x60] sm:$0xff]  ;;  %v220_v51 = vld [vmem:[%s558_s27 + $0x68] sm:$0xff]  ;;  %v221_v55 = vld [vmem:[%s558_s27 + $0x70] sm:$0xff] }
  0x16   : > { %v269_v11 = vmax.f32 %v253_v7, 0.0  ;;  %v270_v12 = vmax.f32 %v254_v8, 0.0  ;;  %v271_v16 = vmax.f32 %v255_v13, 0.0  ;;  %v259_v29 = vadd.f32 %v563_v1, %v236_v26  ;;  %v222_v59 = vld [vmem:[%s558_s27 + $0x78] sm:$0xff] }
  0x17   : > { %v272_v20 = vmax.f32 %v256_v17, 0.0  ;;  %v273_v24 = vmax.f32 %v257_v21, 0.0  ;;  %v274_v28 = vmax.f32 %v258_v25, 0.0  ;;  %v260_v33 = vadd.f32 %v563_v1, %v237_v30 }
  0x18   : > { %285 = vxpose.xlu0.b32.start [1/16] (narrow) %v269_v11, 8  ;;  %v275_v32 = vmax.f32 %v259_v29, 0.0  ;;  %v238_v34 = vmul.f32 %v553_v0, %v215_v31  ;;  %v239_v38 = vmul.f32 %v553_v0, %v216_v35  ;;  %v240_v42 = vmul.f32 %v553_v0, %v217_v39 }
  0x19   : > { %v276_v36 = vmax.f32 %v260_v33, 0.0  ;;  %v241_v46 = vmul.f32 %v553_v0, %v218_v43  ;;  %v242_v50 = vmul.f32 %v553_v0, %v219_v47  ;;  %v243_v54 = vmul.f32 %v553_v0, %v220_v51 }
  0x1a   : > { %v261_v37 = vadd.f32 %v563_v1, %v238_v34  ;;  %v262_v41 = vadd.f32 %v563_v1, %v239_v38  ;;  %v263_v45 = vadd.f32 %v563_v1, %v240_v42  ;;  %v244_v58 = vmul.f32 %v553_v0, %v221_v55 }
  0x1b   : > { %v264_v49 = vadd.f32 %v563_v1, %v241_v46  ;;  %v265_v53 = vadd.f32 %v563_v1, %v242_v50  ;;  %v266_v57 = vadd.f32 %v563_v1, %v243_v54  ;;  %v245_v62 = vmul.f32 %v553_v0, %v222_v59 }
  0x1c   : > { %286 = vxpose.xlu0.b32.cont [2/16] (narrow) %v270_v12, 8  ;;  %v277_v40 = vmax.f32 %v261_v37, 0.0  ;;  %v278_v44 = vmax.f32 %v262_v41, 0.0  ;;  %v279_v48 = vmax.f32 %v263_v45, 0.0  ;;  %v267_v61 = vadd.f32 %v563_v1, %v244_v58 }
  0x1d   : > { %v280_v52 = vmax.f32 %v264_v49, 0.0  ;;  %v281_v56 = vmax.f32 %v265_v53, 0.0  ;;  %v282_v60 = vmax.f32 %v266_v57, 0.0  ;;  %v268_v2 = vadd.f32 %v563_v1, %v245_v62 }
  0x1e   : > { %v283_v63 = vmax.f32 %v267_v61, 0.0 }
  0x1f   : > { %v284_v3 = vmax.f32 %v268_v2, 0.0 }
  0x20   : > { %287 = vxpose.xlu0.b32.cont [3/16] (narrow) %v271_v16, 8 }
  0x24   : > { %288 = vxpose.xlu0.b32.cont [4/16] (narrow) %v272_v20, 8 }
  0x28   : > { %289 = vxpose.xlu0.b32.cont [5/16] (narrow) %v273_v24, 8 }
  0x2c   : > { %290 = vxpose.xlu0.b32.cont [6/16] (narrow) %v274_v28, 8 }
  0x30   : > { %291 = vxpose.xlu0.b32.cont [7/16] (narrow) %v275_v32, 8 }
  0x34   : > { %292 = vxpose.xlu0.b32.cont [8/16] (narrow) %v276_v36, 8 }
  0x38   : > { %293 = vxpose.xlu0.b32.cont [9/16] (narrow) %v277_v40, 8 }
  0x3c   : > { %294 = vxpose.xlu0.b32.cont [10/16] (narrow) %v278_v44, 8 }
  0x40   : > { %295 = vxpose.xlu0.b32.cont [11/16] (narrow) %v279_v48, 8 }
  0x44   : > { %296 = vxpose.xlu0.b32.cont [12/16] (narrow) %v280_v52, 8 }
  0x48   : > { %297 = vxpose.xlu0.b32.cont [13/16] (narrow) %v281_v56, 8 }
  0x4c   : > { %298 = vxpose.xlu0.b32.cont [14/16] (narrow) %v282_v60, 8 }
  0x50   : > { %299 = vxpose.xlu0.b32.cont [15/16] (narrow) %v283_v63, 8 }
  0x54   : > { %300 = vxpose.xlu0.b32.end [16/16] (narrow) %v284_v3, 8 }
  0x94   : > { %v301_v4 = vpop.trf.xlu0 }
  0x95   : > { %317 = vst [vmem:[%s206_s8] sm:$0xff] %v301_v4 }
  0x96 PF: > { %s13_s16 = sadd.s32 1, %s492_s16   ;;  %s639_s12 = smov %s484_s14 }
  0x97   : > { %p10_p8 = scmp.ge.s32.totalorder %s13_s16, 6   ;;  %s640_s13 = smov %s488_s15 }
  0x98   : > { %s641_s14 = smov %s644_s17  ;;  %s642_s15 = smov %s648_s18 }
  0x99   :  { %12 = sbr.rel (!%p10_p8) target bundleno = 3 (0x3), region = 62 }

// kernel: conv_bn_module_forward.2
= control target key start
LH: loop header
LB: loop body
LE: loop exit
PB: predicated region body
PF: predicated region fallthrough
CT: control target
= control target key end

     0   :  { %s1935_s12 = smov 0   ;;  %s1937_s13 = smov 0   ;;  %s2602_s0 = inlined_call_operand.vmem [shape: f32[2,18,18,4], index: 0, kind: input, shape index: {}]   ;;  %s2603_s1 = inlined_call_operand.vmem [shape: f32[36,8], index: 1, kind: input, shape index: {}]   ;;  %s2604_s2 = inlined_call_operand.vmem [shape: f32[512,8], index: 2, kind: output, shape index: {0}]   ;;  %s2605_s3 = inlined_call_operand.vmem [shape: f32[16,8], index: 3, kind: output, shape index: {1}]  }
   0x1   :  { %s1939_s14 = smov 0   ;;  %s1941_s15 = smov 0  }
   0x2   :  { %s1943_s16 = smov 0  }
   0x3 LB: > { %s23_s17 = sadd.s32 1, %s1893_s14  ;;  %s26_s18 = sadd.s32 1, %s1897_s15  ;;  %s1901_s16 = sphi %s1943_s16, %s14_s16   ;;  %s1897_s15 = sphi %s1941_s15, %s2609_s15   ;;  %s1893_s14 = sphi %s1939_s14, %s2608_s14   ;;  %s1889_s13 = sphi %s1937_s13, %s2607_s13   ;;  %s1885_s12 = sphi %s1935_s12, %s2606_s12  }
   0x4   : > { %p24_p0 = scmp.ge.s32.totalorder %s23_s17, 2  ;;  %p1519_p1 = scmp.ge.s32.totalorder %s1901_s16, 1 }
   0x5   : > { %p156_p2 = scmp.lt.s32.totalorder %s1901_s16, 5 }
   0x6   : > { %s2611_s17 = smov (%p24_p0, %s23_s17), 0  ;;  %s2613_s18 = smov (!%p24_p0, %s26_s18), %s1897_s15 }
   0x7   : > { %p157_p3 = pnand %p1519_p1, %p156_p2  ;;  %p28_p4 = scmp.ge.s32.totalorder %s2613_s18, 2 }
   0x8   : > { %p186_p5 = scmp.lt.s32.totalorder (!%p157_p3), %s1889_s13, 1  ;;  %s1521_s19 = sshll.u32 (!%p157_p3), %s1889_s13, 1 }
   0x9   : > { %s2615_s18 = smov (%p28_p4, %s2613_s18), 0  ;;  %160 = sbr.rel (%p157_p3) target bundleno = 823 (0x337), region = 28 }
   0xa   : > { %s192_s20 = sadd.s32 (!%p157_p3), %s1885_s12, %s1521_s19  ;;  %p1525_p7 = scmp.ne.s32.totalorder (!%p157_p3), %s1885_s12, 0 }
   0xb   : > { %s1522_s21 = sshll.u32 (!%p157_p3), %s192_s20, 4 }
   0xc   : > { %p194_p6 = scmp.lt.s32.totalorder (!%p157_p3), %s1522_s21, 63 }
   0xe   : > { %s2617_s13 = smov (!%p186_p5, %s1889_s13), 1  ;;  %s2619_s21 = smov (!%p194_p6, %s1522_s21), 63 }
   0xf   : > { %s1810_s22 = smul.u32 432, %s2617_s13  ;;  %s1524_s23 = sshll.u32 %s2617_s13, 3 }
  0x10   : > { %s1974_s29 = scalar_lea.vmem %s2605_s3, %s1524_s23  ;;  %s1523_s30 = sshll.u32 %s2619_s21, 3 }
  0x11   : > { %s190_s26 = scalar_lea.vmem %s2602_s0, %s1810_s22  ;;  %s1979_s6 = scalar_lea.vmem %s2604_s2, %s1523_s30 }
  0x12   : > { %208 = sbr.rel (%p1525_p7) target bundleno = 25 (0x19), region = 32 }
  0x17   : > { %vm209_vm0 = vcmask 64512   ;;  %v1903_v0 = vmov 0.0  }
  0x18   : > { %210 = vst.msk [vmem:[%s1974_s29] sm:$0xff] %vm209_vm0, %v1903_v0 }
  0x19 PF: > { %s1527_s7 = smul.u32 192, %s1885_s12  ;;  %s1904_s9 = smov 8   ;;  %v1016_v12 = vld [vmem:[%s2603_s1 + $0x20] sm:$0xf]  ;;  %vm1066_vm1 = vcmask 1043456   ;;  %v1015_v13 = vld [vmem:[%s2603_s1 + $0x18] sm:$0xff] }
  0x1a   : > { %s1905_s10 = smov 4   ;;  %s1906_s11 = smov 12   ;;  %1706 = vmatprep.subr.msk.mxu0 %vm1066_vm1, %v1016_v12  ;;  %v1014_v16 = vld [vmem:[%s2603_s1 + $0x10] sm:$0xff]  ;;  %v1013_v17 = vld [vmem:[%s2603_s1 + $0x8] sm:$0xff]  ;;  %v1012_v18 = vld [vmem:[%s2603_s1] sm:$0xff]  ;;  %vm876_vm2 = vcmask 31744  }
  0x1b   : > { %s1984_s8 = scalar_lea.vmem %s190_s26, %s1527_s7  ;;  %s1907_s12 = smov 16   ;;  %1707 = vmatpush3.msk.msra.mxu0 %vm1066_vm1, %v1016_v12  ;;  %vm893_vm3 = vcmask 64512   ;;  %vm910_vm4 = vcmask 97280   ;;  %vm927_vm5 = vcmask 130048   ;;  %vm944_vm6 = vcmask 162816  }
  0x1c   : > { %v246_v1 = vld [vmem:[%s1984_s8 + $0x2] sm:$0xff]  ;;  %v247_v3 = vld [vmem:[%s1984_s8 + $0xa] sm:$0xff]  ;;  %v1998_v6 = vld [vmem:[%s1984_s8 + $0x18] sm:$0xff]  ;;  %s1908_s13 = smov 20   ;;  %s1909_s19 = smov 24   ;;  %1708 = vmatprep.subr.mxu0 %v1015_v13  ;;  %vm961_vm7 = vcmask 195584  }
  0x1d   : > { %v230_v2 = vld [vmem:[%s1984_s8 + $0x1] sm:$0xff]  ;;  %444 = vrot.lane.b32.xlu1 %v246_v1, %s1904_s9  ;;  %v231_v4 = vld [vmem:[%s1984_s8 + $0x9] sm:$0xff]  ;;  %v232_v7 = vld [vmem:[%s1984_s8 + $0x19] sm:$0xff]  ;;  %1709 = vmatpush3.msra.mxu0 %v1015_v13  ;;  %s1910_s28 = smov 28   ;;  %s1911_s5 = smov 32   ;;  %vm978_vm8 = vcmask 228352  }
  0x1e   : > { %380 = vrot.lane.b32.xlu0 %v230_v2, %s1905_s10  ;;  %v1995_v5 = vld [vmem:[%s1984_s8 + $0x20] sm:$0xff]  ;;  %v2014_v10 = vld [vmem:[%s1984_s8 + $0x30] sm:$0xff]  ;;  %v2031_v15 = vld [vmem:[%s1984_s8 + $0x38] sm:$0xff]  ;;  %1710 = vmatprep.subr.mxu0 %v1014_v16  ;;  %vm995_vm9 = vcmask 261120   ;;  %vm1017_vm10 = vcmask 293888   ;;  %vm1913_vm11 = vmmov 0  }
  0x1f   : > { %v1562_v8 = vld [vmem:[%s1984_s8 + $0x1a] sm:$0xff]  ;;  %v1563_v11 = vld [vmem:[%s1984_s8 + $0x22] sm:$0xff]  ;;  %v1596_v14 = vld [vmem:[%s1984_s8 + $0x31] sm:$0xff]  ;;  %1711 = vmatpush3.msra.mxu0 %v1014_v16 }
  0x20   : > { %v1547_v9 = vld [vmem:[%s1984_s8 + $0x21] sm:$0xff]  ;;  %1712 = vmatprep.subr.mxu0 %v1013_v17  ;;  %v1612_v19 = vld [vmem:[%s1984_s8 + $0x32] sm:$0xff]  ;;  %v1598_v23 = vld [vmem:[%s1984_s8 + $0x49] sm:$0xff] }
  0x21   : > { %446 = vrot.lane.b32.xlu1 %v247_v3, %s1904_s9  ;;  %1713 = vmatpush3.msra.mxu0 %v1013_v17  ;;  %v1597_v20 = vld [vmem:[%s1984_s8 + $0x39] sm:$0xff]  ;;  %v2060_v22 = vld [vmem:[%s1984_s8 + $0x48] sm:$0xff]  ;;  %v2070_v24 = vld [vmem:[%s1984_s8 + $0x50] sm:$0xff] }
  0x22   : > { %382 = vrot.lane.b32.xlu0 %v231_v4, %s1905_s10  ;;  %1714 = vmatprep.subr.mxu0 %v1012_v18  ;;  %v1613_v21 = vld [vmem:[%s1984_s8 + $0x3a] sm:$0xff]  ;;  %v1614_v25 = vld [vmem:[%s1984_s8 + $0x4a] sm:$0xff]  ;;  %v1615_v27 = vld [vmem:[%s1984_s8 + $0x52] sm:$0xff] }
  0x23   : > { %1715 = vmatpush3.msra.mxu0 %v1012_v18  ;;  %v1599_v26 = vld [vmem:[%s1984_s8 + $0x51] sm:$0xff]  ;;  %v2090_v28 = vld [vmem:[%s1984_s8 + $0x60] sm:$0xff]  ;;  %v2100_v30 = vld [vmem:[%s1984_s8 + $0x68] sm:$0xff] }
  0x24   : > { %v1600_v29 = vld [vmem:[%s1984_s8 + $0x61] sm:$0xff]  ;;  %v1601_v32 = vld [vmem:[%s1984_s8 + $0x69] sm:$0xff]  ;;  %v2120_v36 = vld [vmem:[%s1984_s8 + $0x78] sm:$0xff] }
  0x25   : > { %510 = vrot.lane.b32.xlu1 %v1995_v5, %s1906_s11  ;;  %v1616_v31 = vld [vmem:[%s1984_s8 + $0x62] sm:$0xff]  ;;  %v1617_v33 = vld [vmem:[%s1984_s8 + $0x6a] sm:$0xff]  ;;  %v1602_v41 = vld [vmem:[%s1984_s8 + $0x79] sm:$0xff] }
  0x26   : > { %508 = vrot.lane.b32.xlu0 %v1998_v6, %s1906_s11  ;;  %v2134_v42 = vld [vmem:[%s1984_s8 + $0x80] sm:$0xff]  ;;  %v2167_v61 = vld [vmem:[%s1984_s8 + $0x90] sm:$0xff]  ;;  %v215_v1 = vld [vmem:[%s1984_s8 + $0x8] sm:$0xff] }
  0x27   : > { %v1618_v47 = vld [vmem:[%s1984_s8 + $0x7a] sm:$0xff]  ;;  %v1619_v53 = vld [vmem:[%s1984_s8 + $0x82] sm:$0xff] }
  0x28   : > { %v1603_v48 = vld [vmem:[%s1984_s8 + $0x81] sm:$0xff]  ;;  %v2192_v16 = vld [vmem:[%s1984_s8 + $0x98] sm:$0xff] }
  0x29   : > { %384 = vrot.lane.b32.xlu1 %v232_v7, %s1905_s10  ;;  %v214_v56 = vld [vmem:[%s1984_s8] sm:$0xff] }
  0x2a   : > { %572 = vrot.lane.b32.xlu0 %v232_v7, %s1907_s12 }
  0x2d   : > { %636 = vrot.lane.b32.xlu1 %v1562_v8, %s1908_s13 }
  0x2e   : > { %574 = vrot.lane.b32.xlu0 %v1547_v9, %s1907_s12 }
  0x31   : > { %448 = vrot.lane.b32.xlu1 %v1562_v8, %s1904_s9 }
  0x32   : > { %386 = vrot.lane.b32.xlu0 %v1547_v9, %s1905_s10 }
  0x35   : > { %700 = vrot.lane.b32.xlu1 %v2014_v10, %s1909_s19 }
  0x36   : > { %638 = vrot.lane.b32.xlu0 %v1563_v11, %s1908_s13 }
  0x39   : > { %512 = vrot.lane.b32.xlu1 %v2014_v10, %s1906_s11 }
  0x3a   : > { %450 = vrot.lane.b32.xlu0 %v1563_v11, %s1904_s9 }
  0x3d   : > { %764 = vrot.lane.b32.xlu1 %v1596_v14, %s1910_s28 }
  0x3e   : > { %702 = vrot.lane.b32.xlu0 %v2031_v15, %s1909_s19 }
  0x41   : > { %576 = vrot.lane.b32.xlu1 %v1596_v14, %s1907_s12 }
  0x42   : > { %514 = vrot.lane.b32.xlu0 %v2031_v15, %s1906_s11 }
  0x45   : > { %828 = vrot.lane.b32.xlu1 %v1612_v19, %s1911_s5 }
  0x46   : > { %766 = vrot.lane.b32.xlu0 %v1597_v20, %s1910_s28 }
  0x49   : > { %578 = vrot.lane.b32.xlu1 %v1597_v20, %s1907_s12 }
  0x4a   : > { %388 = vrot.lane.b32.xlu0 %v1596_v14, %s1905_s10  ;;  %v1604_v14 = vld [vmem:[%s1984_s8 + $0x91] sm:$0xff] }
  0x4d   : > { %830 = vrot.lane.b32.xlu1 %v1613_v21, %s1911_s5 }
  0x4e   : > { %640 = vrot.lane.b32.xlu0 %v1612_v19, %s1908_s13 }
  0x51   : > { %452 = vrot.lane.b32.xlu1 %v1612_v19, %s1904_s9 }
  0x52   : > { %390 = vrot.lane.b32.xlu0 %v1597_v20, %s1905_s10 }
  0x55   : > { %704 = vrot.lane.b32.xlu1 %v2060_v22, %s1909_s19 }
  0x56   : > { %642 = vrot.lane.b32.xlu0 %v1613_v21, %s1908_s13 }
  0x59   : > { %516 = vrot.lane.b32.xlu1 %v2060_v22, %s1906_s11 }
  0x5a   : > { %454 = vrot.lane.b32.xlu0 %v1613_v21, %s1904_s9 }
  0x5d   : > { %768 = vrot.lane.b32.xlu1 %v1598_v23, %s1910_s28 }
  0x5e   : > { %706 = vrot.lane.b32.xlu0 %v2070_v24, %s1909_s19 }
  0x61   : > { %580 = vrot.lane.b32.xlu1 %v1598_v23, %s1907_s12 }
  0x62   : > { %518 = vrot.lane.b32.xlu0 %v2070_v24, %s1906_s11 }
  0x65   : > { %832 = vrot.lane.b32.xlu1 %v1614_v25, %s1911_s5 }
  0x66   : > { %770 = vrot.lane.b32.xlu0 %v1599_v26, %s1910_s28 }
  0x69   : > { %582 = vrot.lane.b32.xlu1 %v1599_v26, %s1907_s12 }
  0x6a   : > { %392 = vrot.lane.b32.xlu0 %v1598_v23, %s1905_s10 }
  0x6d   : > { %834 = vrot.lane.b32.xlu1 %v1615_v27, %s1911_s5 }
  0x6e   : > { %644 = vrot.lane.b32.xlu0 %v1614_v25, %s1908_s13 }
  0x71   : > { %456 = vrot.lane.b32.xlu1 %v1614_v25, %s1904_s9 }
  0x72   : > { %394 = vrot.lane.b32.xlu0 %v1599_v26, %s1905_s10 }
  0x75   : > { %708 = vrot.lane.b32.xlu1 %v2090_v28, %s1909_s19 }
  0x76   : > { %646 = vrot.lane.b32.xlu0 %v1615_v27, %s1908_s13 }
  0x79   : > { %520 = vrot.lane.b32.xlu1 %v2090_v28, %s1906_s11 }
  0x7a   : > { %458 = vrot.lane.b32.xlu0 %v1615_v27, %s1904_s9 }
  0x7d   : > { %772 = vrot.lane.b32.xlu1 %v1600_v29, %s1910_s28 }
  0x7e   : > { %710 = vrot.lane.b32.xlu0 %v2100_v30, %s1909_s19 }
  0x81   : > { %584 = vrot.lane.b32.xlu1 %v1600_v29, %s1907_s12 }
  0x82   : > { %522 = vrot.lane.b32.xlu0 %v2100_v30, %s1906_s11 }
  0x85   : > { %836 = vrot.lane.b32.xlu1 %v1616_v31, %s1911_s5 }
  0x86   : > { %774 = vrot.lane.b32.xlu0 %v1601_v32, %s1910_s28 }
  0x89   : > { %586 = vrot.lane.b32.xlu1 %v1601_v32, %s1907_s12 }
  0x8a   : > { %396 = vrot.lane.b32.xlu0 %v1600_v29, %s1905_s10 }
  0x8d   : > { %838 = vrot.lane.b32.xlu1 %v1617_v33, %s1911_s5 }
  0x8e   : > { %648 = vrot.lane.b32.xlu0 %v1616_v31, %s1908_s13 }
  0x8f   : > { %v445_v34 = vpop.permute.xlu1 %444 }
  0x90   : > { %v381_v35 = vpop.permute.xlu0 %380 }
  0x91   : > { %460 = vrot.lane.b32.xlu1 %v1616_v31, %s1904_s9  ;;  %v877_v57 = vsel %vm876_vm2, %v214_v56, %v381_v35  ;;  %v1620_v31 = vld [vmem:[%s1984_s8 + $0x92] sm:$0xff] }
  0x92   : > { %398 = vrot.lane.b32.xlu0 %v1601_v32, %s1905_s10  ;;  %v894_v60 = vsel %vm893_vm3, %v877_v57, %v445_v34  ;;  %v1605_v32 = vld [vmem:[%s1984_s8 + $0x99] sm:$0xff] }
  0x93   : > { %v2122_v37 = vpop.permute.xlu1 %446 }
  0x94   : > { %v383_v38 = vpop.permute.xlu0 %382 }
  0x95   : > { %712 = vrot.lane.b32.xlu1 %v2120_v36, %s1909_s19  ;;  %v878_v7 = vsel %vm876_vm2, %v215_v1, %v383_v38  ;;  %v1621_v38 = vld [vmem:[%s1984_s8 + $0x9a] sm:$0xff] }
  0x96   : > { %650 = vrot.lane.b32.xlu0 %v1617_v33, %s1908_s13  ;;  %v895_v13 = vsel %vm893_vm3, %v878_v7, %v2122_v37 }
  0x97   : > { %v2127_v39 = vpop.permute.xlu1 %510 }
  0x98   : > { %v509_v40 = vpop.permute.xlu0 %508  ;;  %v912_v17 = vsel %vm910_vm4, %v895_v13, %v2127_v39 }
  0x99   : > { %524 = vrot.lane.b32.xlu1 %v2120_v36, %s1906_s11  ;;  %v911_v62 = vsel %vm910_vm4, %v894_v60, %v509_v40  ;;  %v1606_v60 = vld [vmem:[%s1984_s8 + $0xa9] sm:$0xff] }
  0x9a   : > { %462 = vrot.lane.b32.xlu0 %v1617_v33, %s1904_s9 }
  0x9b   : > { %v2136_v43 = vpop.permute.xlu1 %384 }
  0x9c   : > { %v573_v44 = vpop.permute.xlu0 %572 }
  0x9d   : > { %776 = vrot.lane.b32.xlu1 %v1602_v41, %s1910_s28  ;;  %v928_v2 = vsel %vm927_vm5, %v911_v62, %v573_v44  ;;  %v2261_v62 = vld [vmem:[%s1984_s8 + $0xb0] sm:$0xff] }
  0x9e   : > { %714 = vrot.lane.b32.xlu0 %v2134_v42, %s1909_s19 }
  0x9f   : > { %v637_v45 = vpop.permute.xlu1 %636 }
  0xa0   : > { %v575_v46 = vpop.permute.xlu0 %574  ;;  %v945_v3 = vsel %vm944_vm6, %v928_v2, %v637_v45  ;;  %v879_v45 = vsel %vm876_vm2, %v1998_v6, %v2136_v43 }
  0xa1   : > { %588 = vrot.lane.b32.xlu1 %v1602_v41, %s1907_s12  ;;  %v929_v20 = vsel %vm927_vm5, %v912_v17, %v575_v46  ;;  %v1623_v17 = vld [vmem:[%s1984_s8 + $0xb2] sm:$0xff] }
  0xa2   : > { %526 = vrot.lane.b32.xlu0 %v2134_v42, %s1906_s11 }
  0xa3   : > { %v2146_v49 = vpop.permute.xlu1 %448 }
  0xa4   : > { %v2148_v50 = vpop.permute.xlu0 %386  ;;  %v896_v46 = vsel %vm893_vm3, %v879_v45, %v2146_v49  ;;  %v1608_v45 = vld [vmem:[%s1984_s8 + $0xc1] sm:$0xff] }
  0xa5   : > { %840 = vrot.lane.b32.xlu1 %v1618_v47, %s1911_s5 }
  0xa6   : > { %778 = vrot.lane.b32.xlu0 %v1603_v48, %s1910_s28 }
  0xa7   : > { %v701_v51 = vpop.permute.xlu1 %700 }
  0xa8   : > { %v639_v52 = vpop.permute.xlu0 %638  ;;  %v962_v4 = vsel %vm961_vm7, %v945_v3, %v701_v51 }
  0xa9   : > { %590 = vrot.lane.b32.xlu1 %v1603_v48, %s1907_s12  ;;  %v946_v21 = vsel %vm944_vm6, %v929_v20, %v639_v52 }
  0xaa   : > { %400 = vrot.lane.b32.xlu0 %v1602_v41, %s1905_s10 }
  0xab   : > { %v2155_v54 = vpop.permute.xlu1 %512 }
  0xac   : > { %v2157_v55 = vpop.permute.xlu0 %450 }
  0xad   : > { %842 = vrot.lane.b32.xlu1 %v1619_v53, %s1911_s5 }
  0xae   : > { %652 = vrot.lane.b32.xlu0 %v1618_v47, %s1908_s13 }
  0xaf   : > { %v765_v58 = vpop.permute.xlu1 %764 }
  0xb0   : > { %v703_v59 = vpop.permute.xlu0 %702  ;;  %v979_v8 = vsel %vm978_vm8, %v962_v4, %v765_v58  ;;  %v880_v58 = vsel %vm876_vm2, %v1995_v5, %v2148_v50 }
  0xb1   : > { %464 = vrot.lane.b32.xlu1 %v1618_v47, %s1904_s9  ;;  %v963_v23 = vsel %vm961_vm7, %v946_v21, %v703_v59  ;;  %v2235_v47 = vld [vmem:[%s1984_s8 + $0xa8] sm:$0xff]  ;;  %v897_v59 = vsel %vm893_vm3, %v880_v58, %v2157_v55 }
  0xb2   : > { %402 = vrot.lane.b32.xlu0 %v1603_v48, %s1905_s10  ;;  %v913_v48 = vsel %vm910_vm4, %v896_v46, %v2155_v54  ;;  %v1593_v46 = vld [vmem:[%s1984_s8 + $0xc8] sm:$0xff] }
  0xb3   : > { %v2170_v63 = vpop.permute.xlu1 %576 }
  0xb4   : > { %v2172_v0 = vpop.permute.xlu0 %514  ;;  %v930_v6 = vsel %vm927_vm5, %v913_v48, %v2170_v63 }
  0xb5   : > { %716 = vrot.lane.b32.xlu1 %v2167_v61, %s1909_s19  ;;  %v914_v63 = vsel %vm910_vm4, %v897_v59, %v2172_v0 }
  0xb6   : > { %654 = vrot.lane.b32.xlu0 %v1619_v53, %s1908_s13 }
  0xb7   : > { %v829_v9 = vpop.permute.xlu1 %828 }
  0xb8   : > { %v767_v11 = vpop.permute.xlu0 %766  ;;  %v996_v12 = vsel %vm995_vm9, %v979_v8, %v829_v9  ;;  %v1622_v8 = vld [vmem:[%s1984_s8 + $0xaa] sm:$0xff] }
  0xb9   : > { %528 = vrot.lane.b32.xlu1 %v2167_v61, %s1906_s11  ;;  %1716 = vmatprep.mubr.msk.f32.mxu0 %vm1017_vm10, %v996_v12  ;;  %v980_v25 = vsel %vm978_vm8, %v963_v23, %v767_v11  ;;  %v1607_v9 = vld [vmem:[%s1984_s8 + $0xb1] sm:$0xff] }
  0xba   : > { %466 = vrot.lane.b32.xlu0 %v1619_v53, %s1904_s9 }
  0xbb   : > { %v579_v18 = vpop.permute.xlu1 %578 }
  0xbc   : > { %v2196_v19 = vpop.permute.xlu0 %388  ;;  %v931_v50 = vsel %vm927_vm5, %v914_v63, %v579_v18  ;;  %v1577_v63 = vld [vmem:[%s1984_s8 + $0xca] sm:$0xff] }
  0xbd   : > { %780 = vrot.lane.b32.xlu1 %v1604_v14, %s1910_s28 }
  0xbe   : > { %718 = vrot.lane.b32.xlu0 %v2192_v16, %s1909_s19 }
  0xbf   : > { %v831_v26 = vpop.permute.xlu1 %830 }
  0xc0   : > { %v641_v27 = vpop.permute.xlu0 %640  ;;  %v997_v29 = vsel %vm995_vm9, %v980_v25, %v831_v26  ;;  %v881_v25 = vsel %vm876_vm2, %v2014_v10, %v2196_v19 }
  0xc1   : > { %592 = vrot.lane.b32.xlu1 %v1604_v14, %s1907_s12  ;;  %1717 = vmatmul.mubr.msk.f32.vlgmr.msra.gmra.mxu0 %vm1017_vm10, %v997_v29  ;;  %v947_v43 = vsel %vm944_vm6, %v930_v6, %v641_v27  ;;  %v1592_v27 = vld [vmem:[%s1984_s8 + $0xc0] sm:$0xff] }
  0xc2   : > { %530 = vrot.lane.b32.xlu0 %v2192_v16, %s1906_s11 }
  0xc3   : > { %v2212_v33 = vpop.permute.xlu1 %452 }
  0xc4   : > { %v2214_v34 = vpop.permute.xlu0 %390  ;;  %v898_v26 = vsel %vm893_vm3, %v881_v25, %v2212_v33  ;;  %v1626_v25 = vld [vmem:[%s1984_s8 + $0xda] sm:$0xff] }
  0xc5   : > { %844 = vrot.lane.b32.xlu1 %v1620_v31, %s1911_s5 }
  0xc6   : > { %782 = vrot.lane.b32.xlu0 %v1605_v32, %s1910_s28 }
  0xc7   : > { %v705_v35 = vpop.permute.xlu1 %704 }
  0xc8   : > { %v643_v37 = vpop.permute.xlu0 %642  ;;  %v964_v49 = vsel %vm961_vm7, %v947_v43, %v705_v35 }
  0xc9   : > { %594 = vrot.lane.b32.xlu1 %v1605_v32, %s1907_s12  ;;  %v948_v2 = vsel %vm944_vm6, %v931_v50, %v643_v37 }
  0xca   : > { %404 = vrot.lane.b32.xlu0 %v1604_v14, %s1905_s10 }
  0xcb   : > { %v2221_v39 = vpop.permute.xlu1 %516 }
  0xcc   : > { %v2223_v40 = vpop.permute.xlu0 %454  ;;  %v915_v29 = vsel %vm910_vm4, %v898_v26, %v2221_v39 }
  0xcd   : > { %846 = vrot.lane.b32.xlu1 %v1621_v38, %s1911_s5 }
  0xce   : > { %656 = vrot.lane.b32.xlu0 %v1620_v31, %s1908_s13 }
  0xcf   : > { %v769_v41 = vpop.permute.xlu1 %768 }
  0xd0   : > { %v707_v44 = vpop.permute.xlu0 %706  ;;  %v981_v53 = vsel %vm978_vm8, %v964_v49, %v769_v41  ;;  %v882_v41 = vsel %vm876_vm2, %v2031_v15, %v2214_v34 }
  0xd1   : > { %468 = vrot.lane.b32.xlu1 %v1620_v31, %s1904_s9  ;;  %v965_v55 = vsel %vm961_vm7, %v948_v2, %v707_v44  ;;  %v899_v44 = vsel %vm893_vm3, %v882_v41, %v2223_v40  ;;  %v1595_v2 = vld [vmem:[%s1984_s8 + $0xe0] sm:$0xff] }
  0xd2   : > { %406 = vrot.lane.b32.xlu0 %v1605_v32, %s1905_s10 }
  0xd3   : > { %v581_v51 = vpop.permute.xlu1 %580 }
  0xd4   : > { %v2239_v52 = vpop.permute.xlu0 %518  ;;  %v932_v35 = vsel %vm927_vm5, %v915_v29, %v581_v51 }
  0xd5   : > { %720 = vrot.lane.b32.xlu1 %v2235_v47, %s1909_s19  ;;  %v916_v48 = vsel %vm910_vm4, %v899_v44, %v2239_v52 }
  0xd6   : > { %658 = vrot.lane.b32.xlu0 %v1621_v38, %s1908_s13 }
  0xd7   : > { %v833_v54 = vpop.permute.xlu1 %832 }
  0xd8   : > { %v771_v56 = vpop.permute.xlu0 %770  ;;  %v998_v57 = vsel %vm995_vm9, %v981_v53, %v833_v54  ;;  %v1624_v54 = vld [vmem:[%s1984_s8 + $0xc2] sm:$0xff] }
  0xd9   : > { %532 = vrot.lane.b32.xlu1 %v2235_v47, %s1906_s11  ;;  %1719 = vmatprep.mubr.msk.f32.mxu0 %vm1017_vm10, %v998_v57  ;;  %v982_v3 = vsel %vm978_vm8, %v965_v55, %v771_v56  ;;  %v1609_v56 = vld [vmem:[%s1984_s8 + $0xc9] sm:$0xff]  ;;  %v1594_v55 = vld [vmem:[%s1984_s8 + $0xd8] sm:$0xff] }
  0xda   : > { %470 = vrot.lane.b32.xlu0 %v1621_v38, %s1904_s9 }
  0xdb   : > { %v583_v1 = vpop.permute.xlu1 %582 }
  0xdc   : > { %v2265_v5 = vpop.permute.xlu0 %392  ;;  %v933_v15 = vsel %vm927_vm5, %v916_v48, %v583_v1 }
  0xdd   : > { %784 = vrot.lane.b32.xlu1 %v1606_v60, %s1910_s28 }
  0xde   : > { %722 = vrot.lane.b32.xlu0 %v2261_v62, %s1909_s19 }
  0xdf   : > { %v835_v4 = vpop.permute.xlu1 %834 }
  0xe0   : > { %v645_v0 = vpop.permute.xlu0 %644  ;;  %v999_v7 = vsel %vm995_vm9, %v982_v3, %v835_v4 }
  0xe1   : > { %596 = vrot.lane.b32.xlu1 %v1606_v60, %s1907_s12  ;;  %1720 = vmatmul.mubr.msk.f32.gmra.mxu0 %vm1017_vm10, %v999_v7  ;;  %v949_v10 = vsel %vm944_vm6, %v932_v35, %v645_v0  ;;  %v883_v0 = vsel %vm876_vm2, %v2060_v22, %v2265_v5  ;;  %v1627_v5 = vld [vmem:[%s1984_s8 + $0xe2] sm:$0xff] }
  0xe2   : > { %534 = vrot.lane.b32.xlu0 %v2261_v62, %s1906_s11 }
  0xe3   : > { %v2281_v11 = vpop.permute.xlu1 %456 }
  0xe4   : > { %v2283_v12 = vpop.permute.xlu0 %394  ;;  %v900_v7 = vsel %vm893_vm3, %v883_v0, %v2281_v11 }
  0xe5   : > { %848 = vrot.lane.b32.xlu1 %v1622_v8, %s1911_s5  ;;  %v884_v29 = vsel %vm876_vm2, %v2070_v24, %v2283_v12 }
  0xe6   : > { %786 = vrot.lane.b32.xlu0 %v1607_v9, %s1910_s28 }
  0xe7   : > { %v709_v13 = vpop.permute.xlu1 %708 }
  0xe8   : > { %v647_v14 = vpop.permute.xlu0 %646  ;;  %v966_v19 = vsel %vm961_vm7, %v949_v10, %v709_v13 }
  0xe9   : > { %598 = vrot.lane.b32.xlu1 %v1607_v9, %s1907_s12  ;;  %v950_v34 = vsel %vm944_vm6, %v933_v15, %v647_v14 }
  0xea   : > { %408 = vrot.lane.b32.xlu0 %v1606_v60, %s1905_s10 }
  0xeb   : > { %v2290_v18 = vpop.permute.xlu1 %520 }
  0xec   : > { %v2292_v20 = vpop.permute.xlu0 %458  ;;  %v917_v13 = vsel %vm910_vm4, %v900_v7, %v2290_v18 }
  0xed   : > { %850 = vrot.lane.b32.xlu1 %v1623_v17, %s1911_s5 }
  0xee   : > { %660 = vrot.lane.b32.xlu0 %v1622_v8, %s1908_s13 }
  0xef   : > { %v773_v21 = vpop.permute.xlu1 %772 }
  0xf0   : > { %v711_v23 = vpop.permute.xlu0 %710  ;;  %v983_v33 = vsel %vm978_vm8, %v966_v19, %v773_v21 }
  0xf1   : > { %472 = vrot.lane.b32.xlu1 %v1622_v8, %s1904_s9  ;;  %v967_v40 = vsel %vm961_vm7, %v950_v34, %v711_v23  ;;  %v1611_v8 = vld [vmem:[%s1984_s8 + $0xe1] sm:$0xff] }
  0xf2   : > { %410 = vrot.lane.b32.xlu0 %v1607_v9, %s1905_s10  ;;  %v1610_v9 = vld [vmem:[%s1984_s8 + $0xd9] sm:$0xff] }
  0xf3   : > { %v585_v31 = vpop.permute.xlu1 %584 }
  0xf4   : > { %v2306_v32 = vpop.permute.xlu0 %522  ;;  %v934_v21 = vsel %vm927_vm5, %v917_v13, %v585_v31  ;;  %v901_v31 = vsel %vm893_vm3, %v884_v29, %v2292_v20 }
  0xf5   : > { %724 = vrot.lane.b32.xlu1 %v1592_v27, %s1909_s19  ;;  %v918_v35 = vsel %vm910_vm4, %v901_v31, %v2306_v32 }
  0xf6   : > { %662 = vrot.lane.b32.xlu0 %v1623_v17, %s1908_s13 }
  0xf7   : > { %v837_v37 = vpop.permute.xlu1 %836 }
  0xf8   : > { %v775_v38 = vpop.permute.xlu0 %774  ;;  %v1000_v39 = vsel %vm995_vm9, %v983_v33, %v837_v37 }
  0xf9   : > { %536 = vrot.lane.b32.xlu1 %v1592_v27, %s1906_s11  ;;  %1722 = vmatprep.mubr.msk.f32.mxu0 %vm1017_vm10, %v1000_v39  ;;  %v984_v43 = vsel %vm978_vm8, %v967_v40, %v775_v38 }
  0xfa   : > { %474 = vrot.lane.b32.xlu0 %v1623_v17, %s1904_s9 }
  0xfb   : > { %v587_v51 = vpop.permute.xlu1 %586 }
  0xfc   : > { %v2327_v6 = vpop.permute.xlu0 %396  ;;  %v935_v33 = vsel %vm927_vm5, %v918_v35, %v587_v51 }
  0xfd   : > { %788 = vrot.lane.b32.xlu1 %v1608_v45, %s1910_s28  ;;  %v885_v34 = vsel %vm876_vm2, %v2090_v28, %v2327_v6 }
  0xfe   : > { %726 = vrot.lane.b32.xlu0 %v1593_v46, %s1909_s19 }
  0xff   : > { %v839_v49 = vpop.permute.xlu1 %838 }
 0x100   : > { %v649_v53 = vpop.permute.xlu0 %648  ;;  %v1001_v52 = vsel %vm995_vm9, %v984_v43, %v839_v49 }
 0x101   : > { %600 = vrot.lane.b32.xlu1 %v1608_v45, %s1907_s12  ;;  %1723 = vmatmul.mubr.msk.f32.gmra.mxu0 %vm1017_vm10, %v1001_v52  ;;  %v951_v23 = vsel %vm944_vm6, %v934_v21, %v649_v53 }
 0x102   : > { %538 = vrot.lane.b32.xlu0 %v1593_v46, %s1906_s11 }
 0x103   : > { %v2341_v57 = vpop.permute.xlu1 %460 }
 0x104   : > { %v2343_v58 = vpop.permute.xlu0 %398  ;;  %v902_v40 = vsel %vm893_vm3, %v885_v34, %v2341_v57 }
 0x105   : > { %852 = vrot.lane.b32.xlu1 %v1624_v54, %s1911_s5  ;;  %v886_v28 = vsel %vm876_vm2, %v2100_v30, %v2343_v58 }
 0x106   : > { %790 = vrot.lane.b32.xlu0 %v1609_v56, %s1910_s28 }
 0x107   : > { %v713_v59 = vpop.permute.xlu1 %712 }
 0x108   : > { %v651_v60 = vpop.permute.xlu0 %650  ;;  %v968_v22 = vsel %vm961_vm7, %v951_v23, %v713_v59 }
 0x109   : > { %664 = vrot.lane.b32.xlu1 %v1624_v54, %s1908_s13  ;;  %v952_v37 = vsel %vm944_vm6, %v935_v33, %v651_v60 }
 0x10a   : > { %602 = vrot.lane.b32.xlu0 %v1609_v56, %s1907_s12 }
 0x10b   : > { %v525_v1 = vpop.permute.xlu1 %524 }
 0x10c   : > { %v2350_v50 = vpop.permute.xlu0 %462  ;;  %v919_v43 = vsel %vm910_vm4, %v902_v40, %v525_v1 }
 0x10d   : > { %666 = vrot.lane.b32.xlu1 %v1577_v63, %s1908_s13  ;;  %v903_v6 = vsel %vm893_vm3, %v886_v28, %v2350_v50 }
 0x10e   : > { %854 = vrot.lane.b32.xlu0 %v1577_v63, %s1911_s5 }
 0x10f   : > { %v777_v3 = vpop.permute.xlu1 %776 }
 0x110   : > { %v715_v4 = vpop.permute.xlu0 %714  ;;  %v985_v11 = vsel %vm978_vm8, %v968_v22, %v777_v3 }
 0x111   : > { %730 = vrot.lane.b32.xlu1 %v1595_v2, %s1909_s19  ;;  %v969_v24 = vsel %vm961_vm7, %v952_v37, %v715_v4 }
 0x112   : > { %728 = vrot.lane.b32.xlu0 %v1594_v55, %s1909_s19 }
 0x113   : > { %v589_v14 = vpop.permute.xlu1 %588 }
 0x114   : > { %v527_v17 = vpop.permute.xlu0 %526  ;;  %v936_v52 = vsel %vm927_vm5, %v919_v43, %v589_v14 }
 0x115   : > { %794 = vrot.lane.b32.xlu1 %v1611_v8, %s1910_s28  ;;  %v920_v57 = vsel %vm910_vm4, %v903_v6, %v527_v17 }
 0x116   : > { %792 = vrot.lane.b32.xlu0 %v1610_v9, %s1910_s28 }
 0x117   : > { %v841_v26 = vpop.permute.xlu1 %840 }
 0x118   : > { %v779_v27 = vpop.permute.xlu0 %778  ;;  %v1002_v18 = vsel %vm995_vm9, %v985_v11, %v841_v26 }
 0x119   : > { %858 = vrot.lane.b32.xlu1 %v1627_v5, %s1911_s5  ;;  %1725 = vmatprep.mubr.msk.f32.mxu0 %vm1017_vm10, %v1002_v18  ;;  %v986_v12 = vsel %vm978_vm8, %v969_v24, %v779_v27 }
 0x11a   : > { %856 = vrot.lane.b32.xlu0 %v1626_v25, %s1911_s5 }
 0x11b   : > { %v591_v10 = vpop.permute.xlu1 %590 }
 0x11c   : > { %v401_v19 = vpop.permute.xlu0 %400  ;;  %v937_v3 = vsel %vm927_vm5, %v920_v57, %v591_v10 }
 0x11d   : > { %v887_v5 = vsel %vm876_vm2, %v2120_v36, %v401_v19 }
 0x11f   : > { %v843_v38 = vpop.permute.xlu1 %842 }
 0x120   : > { %v653_v39 = vpop.permute.xlu0 %652  ;;  %v1003_v41 = vsel %vm995_vm9, %v986_v12, %v843_v38 }
 0x121   : > { %1726 = vmatmul.mubr.msk.f32.gmra.mxu0 %vm1017_vm10, %v1003_v41  ;;  %v953_v54 = vsel %vm944_vm6, %v936_v52, %v653_v39 }
 0x123   : > { %v465_v20 = vpop.permute.xlu1 %464 }
 0x124   : > { %v403_v44 = vpop.permute.xlu0 %402  ;;  %v904_v25 = vsel %vm893_vm3, %v887_v5, %v465_v20 }
 0x125   : > { %v888_v36 = vsel %vm876_vm2, %v2134_v42, %v403_v44 }
 0x127   : > { %v717_v45 = vpop.permute.xlu1 %716 }
 0x128   : > { %v655_v32 = vpop.permute.xlu0 %654  ;;  %v970_v56 = vsel %vm961_vm7, %v953_v54, %v717_v45 }
 0x129   : > { %v954_v4 = vsel %vm944_vm6, %v937_v3, %v655_v32 }
 0x12b   : > { %v529_v46 = vpop.permute.xlu1 %528 }
 0x12c   : > { %v467_v48 = vpop.permute.xlu0 %466  ;;  %v921_v11 = vsel %vm910_vm4, %v904_v25, %v529_v46 }
 0x12d   : > { %v905_v19 = vsel %vm893_vm3, %v888_v36, %v467_v48 }
 0x12f   : > { %v781_v15 = vpop.permute.xlu1 %780 }
 0x130   : > { %v719_v51 = vpop.permute.xlu0 %718  ;;  %v987_v59 = vsel %vm978_vm8, %v970_v56, %v781_v15 }
 0x131   : > { %v971_v0 = vsel %vm961_vm7, %v954_v4, %v719_v51 }
 0x133   : > { %v593_v49 = vpop.permute.xlu1 %592 }
 0x134   : > { %v531_v53 = vpop.permute.xlu0 %530  ;;  %v938_v18 = vsel %vm927_vm5, %v921_v11, %v593_v49 }
 0x135   : > { %v922_v24 = vsel %vm910_vm4, %v905_v19, %v531_v53 }
 0x137   : > { %v845_v60 = vpop.permute.xlu1 %844 }
 0x138   : > { %v783_v63 = vpop.permute.xlu0 %782  ;;  %v1004_v2 = vsel %vm995_vm9, %v987_v59, %v845_v60 }
 0x139   : > { %1728 = vmatprep.mubr.msk.f32.mxu0 %vm1017_vm10, %v1004_v2  ;;  %v988_v7 = vsel %vm978_vm8, %v971_v0, %v783_v63 }
 0x13b   : > { %v595_v1 = vpop.permute.xlu1 %594 }
 0x13c   : > { %v405_v55 = vpop.permute.xlu0 %404  ;;  %v939_v39 = vsel %vm927_vm5, %v922_v24, %v595_v1 }
 0x13d   : > { %v889_v53 = vsel %vm876_vm2, %v2167_v61, %v405_v55 }
 0x13f   : > { %v847_v8 = vpop.permute.xlu1 %846 }
 0x140   : > { %v657_v9 = vpop.permute.xlu0 %656  ;;  %v1005_v30 = vsel %vm995_vm9, %v988_v7, %v847_v8 }
 0x141   : > { %1729 = vmatmul.mubr.msk.f32.gmra.mxu0 %vm1017_vm10, %v1005_v30  ;;  %v955_v29 = vsel %vm944_vm6, %v938_v18, %v657_v9 }
 0x143   : > { %v469_v58 = vpop.permute.xlu1 %468 }
 0x144   : > { %v407_v50 = vpop.permute.xlu0 %406  ;;  %v906_v52 = vsel %vm893_vm3, %v889_v53, %v469_v58 }
 0x145   : > { %v890_v61 = vsel %vm876_vm2, %v2192_v16, %v407_v50 }
 0x147   : > { %v721_v13 = vpop.permute.xlu1 %720 }
 0x148   : > { %v659_v14 = vpop.permute.xlu0 %658  ;;  %v972_v31 = vsel %vm961_vm7, %v955_v29, %v721_v13 }
 0x149   : > { %v956_v41 = vsel %vm944_vm6, %v939_v39, %v659_v14 }
 0x14b   : > { %v533_v17 = vpop.permute.xlu1 %532 }
 0x14c   : > { %v471_v21 = vpop.permute.xlu0 %470  ;;  %v923_v54 = vsel %vm910_vm4, %v906_v52, %v533_v17 }
 0x14d   : > { %v907_v55 = vsel %vm893_vm3, %v890_v61, %v471_v21 }
 0x14f   : > { %v785_v23 = vpop.permute.xlu1 %784 }
 0x150   : > { %v723_v22 = vpop.permute.xlu0 %722  ;;  %v989_v35 = vsel %vm978_vm8, %v972_v31, %v785_v23 }
 0x151   : > { %v973_v20 = vsel %vm961_vm7, %v956_v41, %v723_v22 }
 0x153   : > { %v597_v26 = vpop.permute.xlu1 %596 }
 0x154   : > { %v535_v27 = vpop.permute.xlu0 %534  ;;  %v940_v60 = vsel %vm927_vm5, %v923_v54, %v597_v26 }
 0x155   : > { %v924_v3 = vsel %vm910_vm4, %v907_v55, %v535_v27 }
 0x157   : > { %v849_v10 = vpop.permute.xlu1 %848 }
 0x158   : > { %v787_v33 = vpop.permute.xlu0 %786  ;;  %v1006_v37 = vsel %vm995_vm9, %v989_v35, %v849_v10 }
 0x159   : > { %1731 = vmatprep.mubr.msk.f32.mxu0 %vm1017_vm10, %v1006_v37  ;;  %v990_v45 = vsel %vm978_vm8, %v973_v20, %v787_v33 }
 0x15b   : > { %v599_v12 = vpop.permute.xlu1 %598 }
 0x15c   : > { %v409_v38 = vpop.permute.xlu0 %408  ;;  %v941_v7 = vsel %vm927_vm5, %v924_v3, %v599_v12 }
 0x15d   : > { %v891_v23 = vsel %vm876_vm2, %v2235_v47, %v409_v38 }
 0x15f   : > { %v851_v32 = vpop.permute.xlu1 %850 }
 0x160   : > { %v661_v46 = vpop.permute.xlu0 %660  ;;  %v1007_v42 = vsel %vm995_vm9, %v990_v45, %v851_v32  ;;  %v1912_v45 = vmov 0.0  }
 0x161   : > { %1732 = vmatmul.mubr.msk.f32.gmra.mxu0 %vm1017_vm10, %v1007_v42  ;;  %v957_v63 = vsel %vm944_vm6, %v940_v60, %v661_v46  ;;  %1775 = vmatprep.subr.mxu0 %v1912_v45 }
 0x162   : > { %1740 = vmatprep.subr.mxu1 %v1912_v45  ;;  %1772 = vmatprep.mubr.msk.f32.mxu1 %vm1913_vm11, %v1912_v45 }
 0x163   : > { %v473_v44 = vpop.permute.xlu1 %472 }
 0x164   : > { %v411_v48 = vpop.permute.xlu0 %410  ;;  %v908_v5 = vsel %vm893_vm3, %v891_v23, %v473_v44 }
 0x165   : > { %v892_v22 = vsel %vm876_vm2, %v2261_v62, %v411_v48 }
 0x167   : > { %v725_v15 = vpop.permute.xlu1 %724 }
 0x168   : > { %v663_v51 = vpop.permute.xlu0 %662  ;;  %v974_v2 = vsel %vm961_vm7, %v957_v63, %v725_v15 }
 0x169   : > { %v958_v8 = vsel %vm944_vm6, %v941_v7, %v663_v51  ;;  %v1914_v7 = vmov 1.0  }
 0x16b   : > { %v537_v34 = vpop.permute.xlu1 %536 }
 0x16c   : > { %v475_v40 = vpop.permute.xlu0 %474  ;;  %v925_v11 = vsel %vm910_vm4, %v908_v5, %v537_v34 }
 0x16d   : > { %v909_v25 = vsel %vm893_vm3, %v892_v22, %v475_v40 }
 0x16f   : > { %v789_v43 = vpop.permute.xlu1 %788 }
 0x170   : > { %v727_v49 = vpop.permute.xlu0 %726  ;;  %v991_v28 = vsel %vm978_vm8, %v974_v2, %v789_v43 }
 0x171   : > { %v975_v9 = vsel %vm961_vm7, %v958_v8, %v727_v49 }
 0x173   : > { %v601_v56 = vpop.permute.xlu1 %600 }
 0x174   : > { %v539_v59 = vpop.permute.xlu0 %538  ;;  %v942_v29 = vsel %vm927_vm5, %v925_v11, %v601_v56 }
 0x175   : > { %v926_v26 = vsel %vm910_vm4, %v909_v25, %v539_v59 }
 0x177   : > { %v853_v6 = vpop.permute.xlu1 %852 }
 0x178   : > { %v791_v57 = vpop.permute.xlu0 %790  ;;  %v1008_v1 = vsel %vm995_vm9, %v991_v28, %v853_v6 }
 0x179   : > { %1734 = vmatprep.mubr.msk.f32.mxu0 %vm1017_vm10, %v1008_v1  ;;  %v992_v30 = vsel %vm978_vm8, %v975_v9, %v791_v57  ;;  %v1231_v57 = vlaneseq  ;;  %v1239_v9 = vld [vmem:[%s1974_s29] sm:$0xff] }
 0x17b   : > { %v665_v4 = vpop.permute.xlu1 %664  ;;  %v1232_v55 = vshrl.u32 %v1231_v57, 7 }
 0x17c   : > { %v603_v0 = vpop.permute.xlu0 %602  ;;  %v959_v62 = vsel %vm944_vm6, %v942_v29, %v665_v4 }
 0x17d   : > { %v943_v47 = vsel %vm927_vm5, %v926_v26, %v603_v0  ;;  %vm1233_vm12 = vcmp.eq.s32.totalorder %v1232_v55, 0  ;;  %vm1236_vm13 = vcmp.eq.s32.totalorder %v1232_v55, 1 }
 0x17f   : > { %v667_v58 = vpop.permute.xlu1 %666 }
 0x180   : > { %v855_v13 = vpop.permute.xlu0 %854  ;;  %v960_v31 = vsel %vm944_vm6, %v943_v47, %v667_v58 }
 0x181   : > { %v1009_v16 = vsel %vm995_vm9, %v992_v30, %v855_v13  ;;  %v2456_v50 = vpop.f32.mrf.mxu0 }
 0x182   : > { %1735 = vmatmul.mubr.msk.f32.gmra.mxu0 %vm1017_vm10, %v1009_v16  ;;  %1216 = vst.msk [vmem:[%s1979_s6 + $0x8] sm:$0xff] %vm893_vm3, %v2456_v50  ;;  %v1241_v4 = vmul.f32 %v2456_v50, %v2456_v50 }
 0x183   : > { %v731_v14 = vpop.permute.xlu1 %730  ;;  %v2461_v21 = vpop.f32.mrf.mxu0 }
 0x184   : > { %v729_v17 = vpop.permute.xlu0 %728  ;;  %1215 = vst.msk [vmem:[%s1979_s6] sm:$0xff] %vm893_vm3, %v2461_v21  ;;  %v977_v35 = vsel %vm961_vm7, %v960_v31, %v731_v14  ;;  %v1240_v0 = vmul.f32 %v2461_v21, %v2461_v21 }
 0x185   : > { %v976_v10 = vsel %vm961_vm7, %v959_v62, %v729_v17 }
 0x187   : > { %v795_v27 = vpop.permute.xlu1 %794 }
 0x188   : > { %v793_v18 = vpop.permute.xlu0 %792  ;;  %v994_v33 = vsel %vm978_vm8, %v977_v35, %v795_v27 }
 0x189   : > { %v993_v37 = vsel %vm978_vm8, %v976_v10, %v793_v18 }
 0x18b   : > { %v859_v36 = vpop.permute.xlu1 %858 }
 0x18c   : > { %v857_v19 = vpop.permute.xlu0 %856  ;;  %v1011_v24 = vsel %vm995_vm9, %v994_v33, %v859_v36 }
 0x18d   : > { %v1010_v12 = vsel %vm995_vm9, %v993_v37, %v857_v19 }
 0x18e   : > { %1737 = vmatprep.mubr.msk.f32.mxu0 %vm1017_vm10, %v1010_v12 }
 0x18f   : > { %1738 = vmatmul.mubr.msk.f32.gmra.mxu0 %vm1017_vm10, %v1011_v24 }
 0x190   : > { %1807 = vmatprep.mubr.msk.f32.mxu0 %vm1913_vm11, %v1912_v45 }
 0x1a1   : > { %v2486_v38 = vpop.f32.mrf.mxu0 }
 0x1a2   : > { %1218 = vst.msk [vmem:[%s1979_s6 + $0x18] sm:$0xff] %vm893_vm3, %v2486_v38  ;;  %v1243_v61 = vmul.f32 %v2486_v38, %v2486_v38 }
 0x1a3   : > { %v2491_v39 = vpop.f32.mrf.mxu0 }
 0x1a4   : > { %1217 = vst.msk [vmem:[%s1979_s6 + $0x10] sm:$0xff] %vm893_vm3, %v2491_v39  ;;  %v1242_v3 = vmul.f32 %v2491_v39, %v2491_v39 }
 0x1c1   : > { %v2496_v41 = vpop.f32.mrf.mxu0 }
 0x1c2   : > { %1220 = vst.msk [vmem:[%s1979_s6 + $0x28] sm:$0xff] %vm893_vm3, %v2496_v41  ;;  %v1245_v6 = vmul.f32 %v2496_v41, %v2496_v41 }
 0x1c3   : > { %v2501_v20 = vpop.f32.mrf.mxu0 }
 0x1c4   : > { %1219 = vst.msk [vmem:[%s1979_s6 + $0x20] sm:$0xff] %vm893_vm3, %v2501_v20  ;;  %v1244_v1 = vmul.f32 %v2501_v20, %v2501_v20 }
 0x1e1   : > { %v1727_v32 = vpop.f32.mrf.mxu0 }
 0x1e2   : > { %1222 = vst.msk [vmem:[%s1979_s6 + $0x38] sm:$0xff] %vm893_vm3, %v1727_v32  ;;  %v1247_v2 = vmul.f32 %v1727_v32, %v1727_v32 }
 0x1e3   : > { %v2510_v46 = vpop.f32.mrf.mxu0 }
 0x1e4   : > { %1221 = vst.msk [vmem:[%s1979_s6 + $0x30] sm:$0xff] %vm893_vm3, %v2510_v46  ;;  %v1246_v28 = vmul.f32 %v2510_v46, %v2510_v46 }
 0x201   : > { %v1730_v42 = vpop.f32.mrf.mxu0 }
 0x202   : > { %1224 = vst.msk [vmem:[%s1979_s6 + $0x48] sm:$0xff] %vm893_vm3, %v1730_v42  ;;  %v1249_v60 = vmul.f32 %v1730_v42, %v1730_v42 }
 0x203   : > { %v1176_v44 = vpop.f32.mrf.mxu0 }
 0x204   : > { %1223 = vst.msk [vmem:[%s1979_s6 + $0x40] sm:$0xff] %vm893_vm3, %v1176_v44  ;;  %v1248_v63 = vmul.f32 %v1176_v44, %v1176_v44 }
 0x221   : > { %v1733_v48 = vpop.f32.mrf.mxu0 }
 0x222   : > { %1226 = vst.msk [vmem:[%s1979_s6 + $0x58] sm:$0xff] %vm893_vm3, %v1733_v48  ;;  %v1251_v56 = vmul.f32 %v1733_v48, %v1733_v48 }
 0x223   : > { %v1186_v15 = vpop.f32.mrf.mxu0 }
 0x224   : > { %1225 = vst.msk [vmem:[%s1979_s6 + $0x50] sm:$0xff] %vm893_vm3, %v1186_v15  ;;  %v1250_v59 = vmul.f32 %v1186_v15, %v1186_v15 }
 0x242   : > { %v1736_v51 = vpop.f32.mrf.mxu0 }
 0x243   : > { %1228 = vst.msk [vmem:[%s1979_s6 + $0x68] sm:$0xff] %vm893_vm3, %v1736_v51  ;;  %v1253_v52 = vmul.f32 %v1736_v51, %v1736_v51 }
 0x244   : > { %v1196_v34 = vpop.f32.mrf.mxu0 }
 0x245   : > { %1227 = vst.msk [vmem:[%s1979_s6 + $0x60] sm:$0xff] %vm893_vm3, %v1196_v34  ;;  %v1252_v54 = vmul.f32 %v1196_v34, %v1196_v34 }
 0x24f   : > { %v1739_v40 = vpop.f32.mrf.mxu0 }
 0x250   : > { %1230 = vst.msk [vmem:[%s1979_s6 + $0x78] sm:$0xff] %vm893_vm3, %v1739_v40  ;;  %1776 = vmatpush3.msra.mxu0 %v1739_v40  ;;  %v1255_v43 = vmul.f32 %v1739_v40, %v1739_v40 }
 0x251   : > { %v1206_v49 = vpop.f32.mrf.mxu0  ;;  %1777 = vmatprep.subr.mxu0 %v1912_v45 }
 0x252   : > { %1229 = vst.msk [vmem:[%s1979_s6 + $0x70] sm:$0xff] %vm893_vm3, %v1206_v49  ;;  %v1254_v53 = vmul.f32 %v1206_v49, %v1206_v49  ;;  %1741 = vmatpush3.msra.mxu1 %v1255_v43  ;;  %1778 = vmatpush3.msra.mxu0 %v1206_v49 }
 0x253   : > { %1742 = vmatprep.subr.mxu1 %v1912_v45  ;;  %1779 = vmatprep.subr.mxu0 %v1912_v45 }
 0x254   : > { %1743 = vmatpush3.msra.mxu1 %v1254_v53  ;;  %1780 = vmatpush3.msra.mxu0 %v1736_v51 }
 0x255   : > { %1744 = vmatprep.subr.mxu1 %v1912_v45  ;;  %1781 = vmatprep.subr.mxu0 %v1912_v45 }
 0x256   : > { %1745 = vmatpush3.msra.mxu1 %v1253_v52  ;;  %1782 = vmatpush3.msra.mxu0 %v1196_v34 }
 0x257   : > { %1746 = vmatprep.subr.mxu1 %v1912_v45  ;;  %1783 = vmatprep.subr.mxu0 %v1912_v45 }
 0x258   : > { %1747 = vmatpush3.msra.mxu1 %v1252_v54  ;;  %1784 = vmatpush3.msra.mxu0 %v1733_v48 }
 0x259   : > { %1748 = vmatprep.subr.mxu1 %v1912_v45  ;;  %1785 = vmatprep.subr.mxu0 %v1912_v45 }
 0x25a   : > { %1749 = vmatpush3.msra.mxu1 %v1251_v56  ;;  %1786 = vmatpush3.msra.mxu0 %v1186_v15 }
 0x25b   : > { %1750 = vmatprep.subr.mxu1 %v1912_v45  ;;  %1787 = vmatprep.subr.mxu0 %v1912_v45 }
 0x25c   : > { %1751 = vmatpush3.msra.mxu1 %v1250_v59  ;;  %1788 = vmatpush3.msra.mxu0 %v1730_v42 }
 0x25d   : > { %1752 = vmatprep.subr.mxu1 %v1912_v45  ;;  %1789 = vmatprep.subr.mxu0 %v1912_v45 }
 0x25e   : > { %1753 = vmatpush3.msra.mxu1 %v1249_v60  ;;  %1790 = vmatpush3.msra.mxu0 %v1176_v44 }
 0x25f   : > { %1754 = vmatprep.subr.mxu1 %v1912_v45  ;;  %1791 = vmatprep.subr.mxu0 %v1912_v45 }
 0x260   : > { %1755 = vmatpush3.msra.mxu1 %v1248_v63  ;;  %1792 = vmatpush3.msra.mxu0 %v1727_v32 }
 0x261   : > { %1756 = vmatprep.subr.mxu1 %v1912_v45  ;;  %1793 = vmatprep.subr.mxu0 %v1912_v45 }
 0x262   : > { %1757 = vmatpush3.msra.mxu1 %v1247_v2  ;;  %1794 = vmatpush3.msra.mxu0 %v2510_v46 }
 0x263   : > { %1758 = vmatprep.subr.mxu1 %v1912_v45  ;;  %1795 = vmatprep.subr.mxu0 %v1912_v45 }
 0x264   : > { %1759 = vmatpush3.msra.mxu1 %v1246_v28  ;;  %1796 = vmatpush3.msra.mxu0 %v2496_v41 }
 0x265   : > { %1760 = vmatprep.subr.mxu1 %v1912_v45  ;;  %1797 = vmatprep.subr.mxu0 %v1912_v45 }
 0x266   : > { %1761 = vmatpush3.msra.mxu1 %v1245_v6  ;;  %1798 = vmatpush3.msra.mxu0 %v2501_v20 }
 0x267   : > { %1762 = vmatprep.subr.mxu1 %v1912_v45  ;;  %1799 = vmatprep.subr.mxu0 %v1912_v45 }
 0x268   : > { %1763 = vmatpush3.msra.mxu1 %v1244_v1  ;;  %1800 = vmatpush3.msra.mxu0 %v2486_v38 }
 0x269   : > { %1764 = vmatprep.subr.mxu1 %v1912_v45  ;;  %1801 = vmatprep.subr.mxu0 %v1912_v45 }
 0x26a   : > { %1765 = vmatpush3.msra.mxu1 %v1243_v61  ;;  %1802 = vmatpush3.msra.mxu0 %v2491_v39 }
 0x26b   : > { %1766 = vmatprep.subr.mxu1 %v1912_v45  ;;  %1803 = vmatprep.subr.mxu0 %v1912_v45 }
 0x26c   : > { %1767 = vmatpush3.msra.mxu1 %v1242_v3  ;;  %1804 = vmatpush3.msra.mxu0 %v2456_v50 }
 0x26d   : > { %1768 = vmatprep.subr.mxu1 %v1912_v45  ;;  %1805 = vmatprep.subr.mxu0 %v1912_v45 }
 0x26e   : > { %1769 = vmatpush3.msra.mxu1 %v1241_v4  ;;  %1806 = vmatpush3.msra.mxu0 %v2461_v21 }
 0x26f   : > { %1770 = vmatprep.subr.mxu1 %v1912_v45  ;;  %1808 = vmatmul.mubr.msk.f32.vlgmr.msra.gmra.mxu0 %vm1233_vm12, %v1914_v7 }
 0x270   : > { %1771 = vmatpush3.msra.mxu1 %v1240_v0 }
 0x271   : > { %1773 = vmatmul.mubr.msk.f32.vlgmr.msra.gmra.mxu1 %vm1236_vm13, %v1914_v7 }
 0x32f   : > { %v1392_v8 = vpop.f32.mrf.mxu0 }
 0x331   : > { %v1322_v30 = vpop.f32.mrf.mxu1  ;;  %v1809_v58 = vpop.f32.mrf.mxu0 }
 0x332   : > { %v1393_v13 = vadd.f32 %v1392_v8, %v1322_v30 }
 0x333   : > { %v1774_v16 = vpop.f32.mrf.mxu1 }
 0x334   : > { %v1396_v50 = vadd.f32 %v1393_v13, %v1239_v9 }
 0x336   : > { %1397 = vst.msk [vmem:[%s1974_s29] sm:$0xff] %vm893_vm3, %v1396_v50 }
 0x337 PF: > { %s14_s16 = sadd.s32 1, %s1901_s16   ;;  %s2606_s12 = smov %s1893_s14 }
 0x338   : > { %p11_p8 = scmp.ge.s32.totalorder %s14_s16, 6   ;;  %s2607_s13 = smov %s1897_s15 }
 0x339   : > { %s2608_s14 = smov %s2611_s17  ;;  %s2609_s15 = smov %s2615_s18 }
 0x33a   :  { %13 = sbr.rel (!%p11_p8) target bundleno = 3 (0x3), region = 77 }

</bundles_post_ra>
